<compile_context>
chip_gen: v7x
topology: tpu7x:2x2x1
jax: 0.10.0
libtpu: 0.0.40
codegen_flags: <defaults>
</compile_context>

<pallas_src>
import math
import functools

import jax
import jax.numpy as jnp
from jax import lax
from jax.experimental import pallas as pl
from jax.experimental.pallas import tpu as pltpu

_F32 = jnp.float32
_BF16 = jnp.bfloat16
_EPS = 1e-5  # PyG LayerNorm default eps


def _elu(y):
    # F.elu(alpha=1.0); the untaken exp branch is clamped so it cannot overflow.
    return jnp.where(y > 0, y, jnp.exp(jnp.minimum(y, 0.0)) - 1.0)


def _vmem_spec():
    return pl.BlockSpec(memory_space=pltpu.MemorySpace.VMEM)


def _vmem_limit_bytes():
    """Generation-aware scoped-VMEM limit (64 MiB physical on v7x, 128 on v5e/v6e)."""
    try:
        cap = int(pltpu.get_tpu_info().vmem_capacity_bytes)
        return max(32 << 20, min(cap - (16 << 20), 112 << 20))
    except Exception:
        return 48 << 20


# ----------------------------------------------------------------------------
# One fused kernel:
#   layer 1: TransformerConv(F->C1, H heads, concat=False) + graph LayerNorm
#            + ELU on nodes;  Linear(De->De) + ELU on edges
#   layer 2: TransformerConv(C1->C2, H heads, concat=False) + graph LayerNorm
#            + ELU on nodes;  Linear(De->Do) + ELU on edges
# Intermediates (x1, e1) and all indicator matrices stay in VMEM / vregs.
# ----------------------------------------------------------------------------
def _encode_block2_kernel(H, C1, C2, G,
                          x_ref, e_ref, src_col_ref, tgt_col_ref, tgt_row_ref,
                          batch_col_ref, batch_row_ref,
                          wn1_ref, bn1_ref, we1_ref, be1_ref, nw1_ref, nb1_ref,
                          wn2_ref, bn2_ref, we2_ref, be2_ref, nw2_ref, nb2_ref,
                          xo_ref, eo_ref):
    N = x_ref.shape[0]
    E = e_ref.shape[0]

    # ---- in-kernel one-hot gather/scatter indicators (no (E,N) HBM traffic) --
    lane_n = lax.broadcasted_iota(jnp.int32, (E, N), 1)          # node id on lanes
    ssrc16 = (lane_n == src_col_ref[...]).astype(_BF16)          # (E,N) gather @ src
    stgt_b = lane_n == tgt_col_ref[...]                          # (E,N) bool
    stgt16 = stgt_b.astype(_BF16)                                # (E,N) gather @ tgt
    subl_n = lax.broadcasted_iota(jnp.int32, (N, E), 0)          # node id on sublanes
    stgtT16 = (subl_n == tgt_row_ref[...]).astype(_BF16)         # (N,E) scatter -> tgt
    BngT = (lax.broadcasted_iota(jnp.int32, (G, N), 0)
            == batch_row_ref[...]).astype(_F32)                  # (G,N) graph scatter
    Bng = (lax.broadcasted_iota(jnp.int32, (N, G), 1)
           == batch_col_ref[...]).astype(_F32)                   # (N,G) graph gather
    cnt = jnp.sum(BngT, axis=1, keepdims=True)                   # (G,1) nodes / graph

    inv_h = 1.0 / float(H)

    def layer(xin, ein, C, wn_ref, bn_ref, we_ref, be_ref, nw_ref, nb_ref):
        HC = H * C
        # fused projections: one node matmul (q|k|v|skip), one edge matmul (We|lin)
        nproj = jnp.dot(xin.astype(_BF16), wn_ref[...],
                        preferred_element_type=_F32) + bn_ref[...]
        eproj = jnp.dot(ein.astype(_BF16), we_ref[...],
                        preferred_element_type=_F32) + be_ref[...]
        q16 = nproj[:, :HC].astype(_BF16)                        # (N,HC)
        kv16 = nproj[:, HC:3 * HC].astype(_BF16)                 # (N,2HC)
        skip = nproj[:, 3 * HC:]                                 # (N,C)  f32
        ep = eproj[:, :HC]                                       # (E,HC) f32 = We @ e
        e_lin = eproj[:, HC:]                                    # (E,Do) f32 = lin(e)

        # gather q at targets, (k|v) at sources: bf16 one-hot matmuls on the MXU
        qe = jnp.dot(stgt16, q16, preferred_element_type=_F32)       # (E,HC)
        kve = jnp.dot(ssrc16, kv16, preferred_element_type=_F32)     # (E,2HC)
        ke = kve[:, :HC] + ep
        ve = kve[:, HC:] + ep

        # attention logits per head: lane slices + VPU reduce (kept in f32)
        qk = qe * ke * (1.0 / math.sqrt(C))                          # (E,HC)
        logits = jnp.concatenate(
            [jnp.sum(qk[:, h * C:(h + 1) * C], axis=1, keepdims=True)
             for h in range(H)], axis=1)                             # (E,H)

        # per-target-group max (matches PyG softmax numerics), masked reduces
        m_cols = []
        for h in range(H):
            masked = jnp.where(stgt_b, logits[:, h:h + 1], -jnp.inf)  # (E,N)
            m_row = jnp.max(masked, axis=0, keepdims=True)            # (1,N)
            m_cols.append(jnp.sum(jnp.where(stgt_b, m_row, 0.0),
                                  axis=1, keepdims=True))             # (E,1) gather back
        m_e = jnp.concatenate(m_cols, axis=1)                         # (E,H)

        # segment softmax: exp in f32, scatter/gather reductions in bf16 on MXU
        p = jnp.exp(logits - m_e)                                     # (E,H)
        denom_n = jnp.dot(stgtT16, p.astype(_BF16),
                          preferred_element_type=_F32)                # (N,H)
        denom_e = jnp.dot(stgt16, denom_n.astype(_BF16),
                          preferred_element_type=_F32)                # (E,H)
        alpha = p * pl.reciprocal(jnp.maximum(denom_e, 1e-30), approx=True)

        # weight values per head, scatter-add to targets, mean over heads + skip
        weighted = jnp.concatenate(
            [ve[:, h * C:(h + 1) * C] * alpha[:, h:h + 1] for h in range(H)],
            axis=1).astype(_BF16)                                     # (E,HC)
        agg = jnp.dot(stgtT16, weighted, preferred_element_type=_F32)  # (N,HC)
        y = skip
        for h in range(H):
            y = y + agg[:, h * C:(h + 1) * C] * inv_h                 # (N,C)

        # PyG graph-mode LayerNorm + ELU (per-graph statistics, small f32 matmuls)
        norm = jnp.maximum(cnt, 1.0) * float(C)                       # (G,1)
        sums = jnp.dot(BngT, y, preferred_element_type=_F32)          # (G,C)
        mean = jnp.sum(sums, axis=1, keepdims=True) / norm            # (G,1)
        xc = y - jnp.dot(Bng, mean, preferred_element_type=_F32)      # (N,C)
        sq = jnp.dot(BngT, xc * xc, preferred_element_type=_F32)      # (G,C)
        var = jnp.sum(sq, axis=1, keepdims=True) / norm               # (G,1)
        rstd = 1.0 / jnp.sqrt(var + _EPS)                             # (G,1)
        z = xc * jnp.dot(Bng, rstd, preferred_element_type=_F32)      # (N,C)
        x_out = _elu(z * nw_ref[...] + nb_ref[...])
        e_out = _elu(e_lin)                                           # dropout = id
        return x_out, e_out

    x1, e1 = layer(x_ref[...], e_ref[...], C1,
                   wn1_ref, bn1_ref, we1_ref, be1_ref, nw1_ref, nb1_ref)
    x2, e2 = layer(x1, e1, C2,
                   wn2_ref, bn2_ref, we2_ref, be2_ref, nw2_ref, nb2_ref)
    xo_ref[...] = x2
    eo_ref[...] = e2


# ----------------------------------------------------------------------------
# Parameter init (glorot weights, zero biases, LN weight=1 / bias=0),
# matching the __init__ shapes of the PyTorch module.
# ----------------------------------------------------------------------------
def _glorot(key, fan_in, fan_out):
    limit = math.sqrt(6.0 / (fan_in + fan_out))
    return jax.random.uniform(key, (fan_in, fan_out), dtype=_F32,
                              minval=-limit, maxval=limit)


def _conv_params(key, f_in, heads, c_out, edge_dim):
    ks = jax.random.split(key, 5)
    hc = heads * c_out
    return dict(
        wq=_glorot(ks[0], f_in, hc), bq=jnp.zeros((1, hc), _F32),
        wk=_glorot(ks[1], f_in, hc), bk=jnp.zeros((1, hc), _F32),
        wv=_glorot(ks[2], f_in, hc), bv=jnp.zeros((1, hc), _F32),
        we=_glorot(ks[3], edge_dim, hc),                      # lin_edge has no bias
        wskip=_glorot(ks[4], f_in, c_out), bskip=jnp.zeros((1, c_out), _F32),
    )


def init_params(key, in_features, n_heads, head_out_feats, in_edge, out_edge):
    k1, k2, k3, k4 = jax.random.split(key, 4)
    return dict(
        conv1=_conv_params(k1, in_features, n_heads, in_features, in_edge),
        conv2=_conv_params(k2, in_features, n_heads, head_out_feats, in_edge),
        norm_w=jnp.ones((1, in_features), _F32),
        norm_b=jnp.zeros((1, in_features), _F32),
        norm2_w=jnp.ones((1, head_out_feats), _F32),
        norm2_b=jnp.zeros((1, head_out_feats), _F32),
        lin_up_w=_glorot(k3, in_edge, in_edge),
        lin_up_b=jnp.zeros((1, in_edge), _F32),
        lin_up2_w=_glorot(k4, in_edge, out_edge),
        lin_up2_b=jnp.zeros((1, out_edge), _F32),
    )


def _fuse_conv_weights(conv, lin_w, lin_b):
    # One lane-dense node projection (q|k|v|skip) and one edge projection (We|lin).
    wnode = jnp.concatenate([conv["wq"], conv["wk"], conv["wv"], conv["wskip"]],
                            axis=1).astype(_BF16)
    bnode = jnp.concatenate([conv["bq"], conv["bk"], conv["bv"], conv["bskip"]], axis=1)
    hc = conv["we"].shape[1]
    wedge = jnp.concatenate([conv["we"], lin_w], axis=1).astype(_BF16)
    bedge = jnp.concatenate([jnp.zeros((1, hc), _F32), lin_b], axis=1)
    return wnode, bnode, wedge, bedge


# ----------------------------------------------------------------------------
# Encode_Block2.forward — single fused pallas_call
# ----------------------------------------------------------------------------
def encode_block2_forward(params, x, edge_index, edge_attr, batch, num_graphs,
                          n_heads, in_features, head_out_feats):
    n = x.shape[0]
    e_cnt = edge_attr.shape[0]
    src = edge_index[0].astype(jnp.int32)   # message source j
    tgt = edge_index[1].astype(jnp.int32)   # message target i
    bat = batch.astype(jnp.int32)

    wn1, bn1, we1, be1 = _fuse_conv_weights(params["conv1"],
                                            params["lin_up_w"], params["lin_up_b"])
    wn2, bn2, we2, be2 = _fuse_conv_weights(params["conv2"],
                                            params["lin_up2_w"], params["lin_up2_b"])
    out_edge = params["lin_up2_w"].shape[1]

    kern = functools.partial(_encode_block2_kernel, n_heads, in_features,
                             head_out_feats, num_graphs)
    return pl.pallas_call(
        kern,
        out_shape=(jax.ShapeDtypeStruct((n, head_out_feats), _F32),
                   jax.ShapeDtypeStruct((e_cnt, out_edge), _F32)),
        in_specs=[_vmem_spec()] * 19,
        out_specs=(_vmem_spec(), _vmem_spec()),
        compiler_params=pltpu.CompilerParams(vmem_limit_bytes=_vmem_limit_bytes()),
    )(x, edge_attr,
      src.reshape(-1, 1), tgt.reshape(-1, 1), tgt.reshape(1, -1),
      bat.reshape(-1, 1), bat.reshape(1, -1),
      wn1, bn1, we1, be1, params["norm_w"], params["norm_b"],
      wn2, bn2, we2, be2, params["norm2_w"], params["norm2_b"])


if __name__ == "__main__":
    # Module hyper-parameters (small, consistent with __init__ signature)
    in_features, n_heads, head_out_feats = 8, 2, 16
    in_edge_feature, out_edge_feature, dp = 6, 4, 0.1   # dp unused (eval mode)

    # Small synthetic graph batch: 2 graphs x 8 nodes, bidirectional ring edges.
    N, G = 16, 2
    npg = N // G
    srcs, tgts = [], []
    for g in range(G):
        off = g * npg
        for i in range(npg):
            j = (i + 1) % npg
            srcs += [off + i, off + j]
            tgts += [off + j, off + i]
    edge_index = jnp.array([srcs, tgts], dtype=jnp.int32)        # (2, E)
    E = edge_index.shape[1]
    batch = jnp.repeat(jnp.arange(G, dtype=jnp.int32), npg)      # (N,)

    key = jax.random.PRNGKey(0)
    kx, ke, kp = jax.random.split(key, 3)
    x = jax.random.normal(kx, (N, in_features), dtype=_F32)
    edge_attr = jax.random.normal(ke, (E, in_edge_feature), dtype=_F32)

    params = init_params(kp, in_features, n_heads, head_out_feats,
                         in_edge_feature, out_edge_feature)

    x_out, edge_out = encode_block2_forward(
        params, x, edge_index, edge_attr, batch, G,
        n_heads, in_features, head_out_feats)
    jax.block_until_ready((x_out, edge_out))

    assert x_out.shape == (N, head_out_feats)
    assert edge_out.shape == (E, out_edge_feature)
    assert bool(jnp.all(jnp.isfinite(x_out))) and bool(jnp.all(jnp.isfinite(edge_out)))
    print("KERNEL_OK")
</pallas_src>

<mosaic_0001>
module attributes {stable_mosaic.version = 11 : i64} {
  func.func @_encode_block2_kernel(%arg0: memref<16x8xf32, #tpu.memory_space<vmem>>, %arg1: memref<32x6xf32, #tpu.memory_space<vmem>>, %arg2: memref<32x1xi32, #tpu.memory_space<vmem>>, %arg3: memref<32x1xi32, #tpu.memory_space<vmem>>, %arg4: memref<1x32xi32, #tpu.memory_space<vmem>>, %arg5: memref<16x1xi32, #tpu.memory_space<vmem>>, %arg6: memref<1x16xi32, #tpu.memory_space<vmem>>, %arg7: memref<8x56xbf16, #tpu.memory_space<vmem>>, %arg8: memref<1x56xf32, #tpu.memory_space<vmem>>, %arg9: memref<6x22xbf16, #tpu.memory_space<vmem>>, %arg10: memref<1x22xf32, #tpu.memory_space<vmem>>, %arg11: memref<1x8xf32, #tpu.memory_space<vmem>>, %arg12: memref<1x8xf32, #tpu.memory_space<vmem>>, %arg13: memref<8x112xbf16, #tpu.memory_space<vmem>>, %arg14: memref<1x112xf32, #tpu.memory_space<vmem>>, %arg15: memref<6x36xbf16, #tpu.memory_space<vmem>>, %arg16: memref<1x36xf32, #tpu.memory_space<vmem>>, %arg17: memref<1x16xf32, #tpu.memory_space<vmem>>, %arg18: memref<1x16xf32, #tpu.memory_space<vmem>>, %arg19: memref<16x16xf32, #tpu.memory_space<vmem>>, %arg20: memref<32x4xf32, #tpu.memory_space<vmem>>) attributes {dimension_semantics = [], scalar_prefetch = 0 : i64, scratch_operands = 0 : i64, tpu.core_type = #tpu.core_type<tc>} {
    %0 = tpu.iota {dimensions = array<i32: 1>} : vector<32x16xi32>
    %c0 = arith.constant 0 : index
    %c0_0 = arith.constant 0 : index
    %1 = vector.load %arg2[%c0, %c0_0] : memref<32x1xi32, #tpu.memory_space<vmem>>, vector<32x1xi32>
    %2 = vector.broadcast %1 : vector<32x1xi32> to vector<32x16xi32>
    %3 = arith.cmpi eq, %0, %2 : vector<32x16xi32>
    %4 = arith.extui %3 : vector<32x16xi1> to vector<32x16xi32>
    %5 = arith.sitofp %4 : vector<32x16xi32> to vector<32x16xf32>
    %6 = arith.truncf %5 : vector<32x16xf32> to vector<32x16xbf16>
    %c0_1 = arith.constant 0 : index
    %c0_2 = arith.constant 0 : index
    %7 = vector.load %arg3[%c0_1, %c0_2] : memref<32x1xi32, #tpu.memory_space<vmem>>, vector<32x1xi32>
    %8 = vector.broadcast %7 : vector<32x1xi32> to vector<32x16xi32>
    %9 = arith.cmpi eq, %0, %8 : vector<32x16xi32>
    %10 = arith.extui %9 : vector<32x16xi1> to vector<32x16xi32>
    %11 = arith.sitofp %10 : vector<32x16xi32> to vector<32x16xf32>
    %12 = arith.truncf %11 : vector<32x16xf32> to vector<32x16xbf16>
    %13 = tpu.iota {dimensions = array<i32: 0>} : vector<16x32xi32>
    %c0_3 = arith.constant 0 : index
    %c0_4 = arith.constant 0 : index
    %14 = vector.load %arg4[%c0_3, %c0_4] : memref<1x32xi32, #tpu.memory_space<vmem>>, vector<1x32xi32>
    %15 = vector.broadcast %14 : vector<1x32xi32> to vector<16x32xi32>
    %16 = arith.cmpi eq, %13, %15 : vector<16x32xi32>
    %17 = arith.extui %16 : vector<16x32xi1> to vector<16x32xi32>
    %18 = arith.sitofp %17 : vector<16x32xi32> to vector<16x32xf32>
    %19 = arith.truncf %18 : vector<16x32xf32> to vector<16x32xbf16>
    %20 = tpu.iota {dimensions = array<i32: 0>} : vector<2x16xi32>
    %c0_5 = arith.constant 0 : index
    %c0_6 = arith.constant 0 : index
    %21 = vector.load %arg6[%c0_5, %c0_6] : memref<1x16xi32, #tpu.memory_space<vmem>>, vector<1x16xi32>
    %22 = vector.broadcast %21 : vector<1x16xi32> to vector<2x16xi32>
    %23 = arith.cmpi eq, %20, %22 : vector<2x16xi32>
    %24 = arith.extui %23 : vector<2x16xi1> to vector<2x16xi32>
    %25 = arith.sitofp %24 : vector<2x16xi32> to vector<2x16xf32>
    %26 = tpu.iota {dimensions = array<i32: 1>} : vector<16x2xi32>
    %c0_7 = arith.constant 0 : index
    %c0_8 = arith.constant 0 : index
    %27 = vector.load %arg5[%c0_7, %c0_8] : memref<16x1xi32, #tpu.memory_space<vmem>>, vector<16x1xi32>
    %28 = vector.broadcast %27 : vector<16x1xi32> to vector<16x2xi32>
    %29 = arith.cmpi eq, %26, %28 : vector<16x2xi32>
    %30 = arith.extui %29 : vector<16x2xi1> to vector<16x2xi32>
    %31 = arith.sitofp %30 : vector<16x2xi32> to vector<16x2xf32>
    %cst = arith.constant dense<0.000000e+00> : vector<2xf32>
    %32 = vector.multi_reduction <add>, %25, %cst [1] : vector<2x16xf32> to vector<2xf32>
    %33 = vector.shape_cast %32 : vector<2xf32> to vector<2x1xf32>
    %c0_9 = arith.constant 0 : index
    %c0_10 = arith.constant 0 : index
    %34 = vector.load %arg0[%c0_9, %c0_10] : memref<16x8xf32, #tpu.memory_space<vmem>>, vector<16x8xf32>
    %c0_11 = arith.constant 0 : index
    %c0_12 = arith.constant 0 : index
    %35 = vector.load %arg1[%c0_11, %c0_12] : memref<32x6xf32, #tpu.memory_space<vmem>>, vector<32x6xf32>
    %36 = arith.truncf %34 : vector<16x8xf32> to vector<16x8xbf16>
    %c0_13 = arith.constant 0 : index
    %c0_14 = arith.constant 0 : index
    %37 = vector.load %arg7[%c0_13, %c0_14] : memref<8x56xbf16, #tpu.memory_space<vmem>>, vector<8x56xbf16>
    %cst_15 = arith.constant dense<0.000000e+00> : vector<16x56xf32>
    %38 = tpu.matmul %36, %37, %cst_15 {dimension_numbers = #tpu.dot_dimension_numbers<[1], [0], [0], [1], [0, 0, 1, 1], [], []>} : vector<16x8xbf16>, vector<8x56xbf16>, vector<16x56xf32> -> vector<16x56xf32>
    %c0_16 = arith.constant 0 : index
    %c0_17 = arith.constant 0 : index
    %39 = vector.load %arg8[%c0_16, %c0_17] : memref<1x56xf32, #tpu.memory_space<vmem>>, vector<1x56xf32>
    %40 = vector.broadcast %39 : vector<1x56xf32> to vector<16x56xf32>
    %41 = arith.addf %38, %40 : vector<16x56xf32>
    %42 = arith.truncf %35 : vector<32x6xf32> to vector<32x6xbf16>
    %c0_18 = arith.constant 0 : index
    %c0_19 = arith.constant 0 : index
    %43 = vector.load %arg9[%c0_18, %c0_19] : memref<6x22xbf16, #tpu.memory_space<vmem>>, vector<6x22xbf16>
    %cst_20 = arith.constant dense<0.000000e+00> : vector<32x22xf32>
    %44 = tpu.matmul %42, %43, %cst_20 {dimension_numbers = #tpu.dot_dimension_numbers<[1], [0], [0], [1], [0, 0, 1, 1], [], []>} : vector<32x6xbf16>, vector<6x22xbf16>, vector<32x22xf32> -> vector<32x22xf32>
    %c0_21 = arith.constant 0 : index
    %c0_22 = arith.constant 0 : index
    %45 = vector.load %arg10[%c0_21, %c0_22] : memref<1x22xf32, #tpu.memory_space<vmem>>, vector<1x22xf32>
    %46 = vector.broadcast %45 : vector<1x22xf32> to vector<32x22xf32>
    %47 = arith.addf %44, %46 : vector<32x22xf32>
    %48 = vector.extract_strided_slice %41 {offsets = [0, 0], sizes = [16, 16], strides = [1, 1]} : vector<16x56xf32> to vector<16x16xf32>
    %49 = arith.truncf %48 : vector<16x16xf32> to vector<16x16xbf16>
    %50 = vector.extract_strided_slice %41 {offsets = [0, 16], sizes = [16, 32], strides = [1, 1]} : vector<16x56xf32> to vector<16x32xf32>
    %51 = arith.truncf %50 : vector<16x32xf32> to vector<16x32xbf16>
    %52 = vector.extract_strided_slice %41 {offsets = [0, 48], sizes = [16, 8], strides = [1, 1]} : vector<16x56xf32> to vector<16x8xf32>
    %53 = vector.extract_strided_slice %47 {offsets = [0, 0], sizes = [32, 16], strides = [1, 1]} : vector<32x22xf32> to vector<32x16xf32>
    %54 = vector.extract_strided_slice %47 {offsets = [0, 16], sizes = [32, 6], strides = [1, 1]} : vector<32x22xf32> to vector<32x6xf32>
    %cst_23 = arith.constant dense<0.000000e+00> : vector<32x16xf32>
    %55 = tpu.matmul %12, %49, %cst_23 {dimension_numbers = #tpu.dot_dimension_numbers<[1], [0], [0], [1], [0, 0, 1, 1], [], []>} : vector<32x16xbf16>, vector<16x16xbf16>, vector<32x16xf32> -> vector<32x16xf32>
    %cst_24 = arith.constant dense<0.000000e+00> : vector<32x32xf32>
    %56 = tpu.matmul %6, %51, %cst_24 {dimension_numbers = #tpu.dot_dimension_numbers<[1], [0], [0], [1], [0, 0, 1, 1], [], []>} : vector<32x16xbf16>, vector<16x32xbf16>, vector<32x32xf32> -> vector<32x32xf32>
    %57 = vector.extract_strided_slice %56 {offsets = [0, 0], sizes = [32, 16], strides = [1, 1]} : vector<32x32xf32> to vector<32x16xf32>
    %58 = arith.addf %57, %53 : vector<32x16xf32>
    %59 = vector.extract_strided_slice %56 {offsets = [0, 16], sizes = [32, 16], strides = [1, 1]} : vector<32x32xf32> to vector<32x16xf32>
    %60 = arith.addf %59, %53 : vector<32x16xf32>
    %61 = arith.mulf %55, %58 : vector<32x16xf32>
    %cst_25 = arith.constant 0.353553385 : f32
    %62 = vector.broadcast %cst_25 : f32 to vector<32x16xf32>
    %63 = arith.mulf %61, %62 : vector<32x16xf32>
    %64 = vector.extract_strided_slice %63 {offsets = [0, 0], sizes = [32, 8], strides = [1, 1]} : vector<32x16xf32> to vector<32x8xf32>
    %cst_26 = arith.constant dense<0.000000e+00> : vector<32xf32>
    %65 = vector.multi_reduction <add>, %64, %cst_26 [1] : vector<32x8xf32> to vector<32xf32>
    %66 = vector.shape_cast %65 : vector<32xf32> to vector<32x1xf32>
    %67 = vector.extract_strided_slice %63 {offsets = [0, 8], sizes = [32, 8], strides = [1, 1]} : vector<32x16xf32> to vector<32x8xf32>
    %cst_27 = arith.constant dense<0.000000e+00> : vector<32xf32>
    %68 = vector.multi_reduction <add>, %67, %cst_27 [1] : vector<32x8xf32> to vector<32xf32>
    %69 = vector.shape_cast %68 : vector<32xf32> to vector<32x1xf32>
    %70 = tpu.concatenate %66, %69 in 1 : vector<32x1xf32>, vector<32x1xf32> -> vector<32x2xf32>
    %71 = vector.extract_strided_slice %70 {offsets = [0, 0], sizes = [32, 1], strides = [1, 1]} : vector<32x2xf32> to vector<32x1xf32>
    %cst_28 = arith.constant 0xFF800000 : f32
    %72 = vector.shape_cast %71 : vector<32x1xf32> to vector<32x1xf32>
    %73 = vector.broadcast %72 : vector<32x1xf32> to vector<32x16xf32>
    %74 = vector.broadcast %cst_28 : f32 to vector<32x16xf32>
    %75 = arith.select %9, %73, %74 : vector<32x16xi1>, vector<32x16xf32>
    %cst_29 = arith.constant dense<0xFF800000> : vector<16xf32>
    %76 = vector.multi_reduction <maximumf>, %75, %cst_29 [0] : vector<32x16xf32> to vector<16xf32>
    %77 = vector.shape_cast %76 : vector<16xf32> to vector<1x16xf32>
    %cst_30 = arith.constant 0.000000e+00 : f32
    %78 = vector.shape_cast %77 : vector<1x16xf32> to vector<1x16xf32>
    %79 = vector.broadcast %78 : vector<1x16xf32> to vector<32x16xf32>
    %80 = vector.broadcast %cst_30 : f32 to vector<32x16xf32>
    %81 = arith.select %9, %79, %80 : vector<32x16xi1>, vector<32x16xf32>
    %cst_31 = arith.constant dense<0.000000e+00> : vector<32xf32>
    %82 = vector.multi_reduction <add>, %81, %cst_31 [1] : vector<32x16xf32> to vector<32xf32>
    %83 = vector.shape_cast %82 : vector<32xf32> to vector<32x1xf32>
    %84 = vector.extract_strided_slice %70 {offsets = [0, 1], sizes = [32, 1], strides = [1, 1]} : vector<32x2xf32> to vector<32x1xf32>
    %cst_32 = arith.constant 0xFF800000 : f32
    %85 = vector.shape_cast %84 : vector<32x1xf32> to vector<32x1xf32>
    %86 = vector.broadcast %85 : vector<32x1xf32> to vector<32x16xf32>
    %87 = vector.broadcast %cst_32 : f32 to vector<32x16xf32>
    %88 = arith.select %9, %86, %87 : vector<32x16xi1>, vector<32x16xf32>
    %cst_33 = arith.constant dense<0xFF800000> : vector<16xf32>
    %89 = vector.multi_reduction <maximumf>, %88, %cst_33 [0] : vector<32x16xf32> to vector<16xf32>
    %90 = vector.shape_cast %89 : vector<16xf32> to vector<1x16xf32>
    %cst_34 = arith.constant 0.000000e+00 : f32
    %91 = vector.shape_cast %90 : vector<1x16xf32> to vector<1x16xf32>
    %92 = vector.broadcast %91 : vector<1x16xf32> to vector<32x16xf32>
    %93 = vector.broadcast %cst_34 : f32 to vector<32x16xf32>
    %94 = arith.select %9, %92, %93 : vector<32x16xi1>, vector<32x16xf32>
    %cst_35 = arith.constant dense<0.000000e+00> : vector<32xf32>
    %95 = vector.multi_reduction <add>, %94, %cst_35 [1] : vector<32x16xf32> to vector<32xf32>
    %96 = vector.shape_cast %95 : vector<32xf32> to vector<32x1xf32>
    %97 = tpu.concatenate %83, %96 in 1 : vector<32x1xf32>, vector<32x1xf32> -> vector<32x2xf32>
    %98 = arith.subf %70, %97 : vector<32x2xf32>
    %99 = math.exp %98 : vector<32x2xf32>
    %100 = arith.truncf %99 : vector<32x2xf32> to vector<32x2xbf16>
    %cst_36 = arith.constant dense<0.000000e+00> : vector<16x2xf32>
    %101 = tpu.matmul %19, %100, %cst_36 {dimension_numbers = #tpu.dot_dimension_numbers<[1], [0], [0], [1], [0, 0, 1, 1], [], []>} : vector<16x32xbf16>, vector<32x2xbf16>, vector<16x2xf32> -> vector<16x2xf32>
    %102 = arith.truncf %101 : vector<16x2xf32> to vector<16x2xbf16>
    %cst_37 = arith.constant dense<0.000000e+00> : vector<32x2xf32>
    %103 = tpu.matmul %12, %102, %cst_37 {dimension_numbers = #tpu.dot_dimension_numbers<[1], [0], [0], [1], [0, 0, 1, 1], [], []>} : vector<32x16xbf16>, vector<16x2xbf16>, vector<32x2xf32> -> vector<32x2xf32>
    %cst_38 = arith.constant 1.000000e-30 : f32
    %104 = vector.broadcast %cst_38 : f32 to vector<32x2xf32>
    %105 = arith.maximumf %103, %104 : vector<32x2xf32>
    %106 = tpu.reciprocal %105 {approx = true} : vector<32x2xf32> -> vector<32x2xf32>
    %107 = arith.mulf %99, %106 : vector<32x2xf32>
    %108 = vector.extract_strided_slice %60 {offsets = [0, 0], sizes = [32, 8], strides = [1, 1]} : vector<32x16xf32> to vector<32x8xf32>
    %109 = vector.extract_strided_slice %107 {offsets = [0, 0], sizes = [32, 1], strides = [1, 1]} : vector<32x2xf32> to vector<32x1xf32>
    %110 = vector.broadcast %109 : vector<32x1xf32> to vector<32x8xf32>
    %111 = arith.mulf %108, %110 : vector<32x8xf32>
    %112 = vector.extract_strided_slice %60 {offsets = [0, 8], sizes = [32, 8], strides = [1, 1]} : vector<32x16xf32> to vector<32x8xf32>
    %113 = vector.extract_strided_slice %107 {offsets = [0, 1], sizes = [32, 1], strides = [1, 1]} : vector<32x2xf32> to vector<32x1xf32>
    %114 = vector.broadcast %113 : vector<32x1xf32> to vector<32x8xf32>
    %115 = arith.mulf %112, %114 : vector<32x8xf32>
    %116 = tpu.concatenate %111, %115 in 1 : vector<32x8xf32>, vector<32x8xf32> -> vector<32x16xf32>
    %117 = arith.truncf %116 : vector<32x16xf32> to vector<32x16xbf16>
    %cst_39 = arith.constant dense<0.000000e+00> : vector<16x16xf32>
    %118 = tpu.matmul %19, %117, %cst_39 {dimension_numbers = #tpu.dot_dimension_numbers<[1], [0], [0], [1], [0, 0, 1, 1], [], []>} : vector<16x32xbf16>, vector<32x16xbf16>, vector<16x16xf32> -> vector<16x16xf32>
    %119 = vector.extract_strided_slice %118 {offsets = [0, 0], sizes = [16, 8], strides = [1, 1]} : vector<16x16xf32> to vector<16x8xf32>
    %cst_40 = arith.constant 5.000000e-01 : f32
    %120 = vector.broadcast %cst_40 : f32 to vector<16x8xf32>
    %121 = arith.mulf %119, %120 : vector<16x8xf32>
    %122 = arith.addf %52, %121 : vector<16x8xf32>
    %123 = vector.extract_strided_slice %118 {offsets = [0, 8], sizes = [16, 8], strides = [1, 1]} : vector<16x16xf32> to vector<16x8xf32>
    %cst_41 = arith.constant 5.000000e-01 : f32
    %124 = vector.broadcast %cst_41 : f32 to vector<16x8xf32>
    %125 = arith.mulf %123, %124 : vector<16x8xf32>
    %126 = arith.addf %122, %125 : vector<16x8xf32>
    %cst_42 = arith.constant 1.000000e+00 : f32
    %127 = vector.broadcast %cst_42 : f32 to vector<2x1xf32>
    %128 = arith.maximumf %33, %127 : vector<2x1xf32>
    %cst_43 = arith.constant 8.000000e+00 : f32
    %129 = vector.broadcast %cst_43 : f32 to vector<2x1xf32>
    %130 = arith.mulf %128, %129 : vector<2x1xf32>
    %cst_44 = arith.constant dense<0.000000e+00> : vector<2x8xf32>
    %131 = tpu.matmul %25, %126, %cst_44 {dimension_numbers = #tpu.dot_dimension_numbers<[1], [0], [0], [1], [0, 0, 1, 1], [], []>} : vector<2x16xf32>, vector<16x8xf32>, vector<2x8xf32> -> vector<2x8xf32>
    %cst_45 = arith.constant dense<0.000000e+00> : vector<2xf32>
    %132 = vector.multi_reduction <add>, %131, %cst_45 [1] : vector<2x8xf32> to vector<2xf32>
    %133 = vector.shape_cast %132 : vector<2xf32> to vector<2x1xf32>
    %134 = arith.divf %133, %130 : vector<2x1xf32>
    %cst_46 = arith.constant dense<0.000000e+00> : vector<16x1xf32>
    %135 = tpu.matmul %31, %134, %cst_46 {dimension_numbers = #tpu.dot_dimension_numbers<[1], [0], [0], [1], [0, 0, 1, 1], [], []>} : vector<16x2xf32>, vector<2x1xf32>, vector<16x1xf32> -> vector<16x1xf32>
    %136 = vector.broadcast %135 : vector<16x1xf32> to vector<16x8xf32>
    %137 = arith.subf %126, %136 : vector<16x8xf32>
    %138 = arith.mulf %137, %137 : vector<16x8xf32>
    %cst_47 = arith.constant dense<0.000000e+00> : vector<2x8xf32>
    %139 = tpu.matmul %25, %138, %cst_47 {dimension_numbers = #tpu.dot_dimension_numbers<[1], [0], [0], [1], [0, 0, 1, 1], [], []>} : vector<2x16xf32>, vector<16x8xf32>, vector<2x8xf32> -> vector<2x8xf32>
    %cst_48 = arith.constant dense<0.000000e+00> : vector<2xf32>
    %140 = vector.multi_reduction <add>, %139, %cst_48 [1] : vector<2x8xf32> to vector<2xf32>
    %141 = vector.shape_cast %140 : vector<2xf32> to vector<2x1xf32>
    %142 = arith.divf %141, %130 : vector<2x1xf32>
    %cst_49 = arith.constant 9.99999974E-6 : f32
    %143 = vector.broadcast %cst_49 : f32 to vector<2x1xf32>
    %144 = arith.addf %142, %143 : vector<2x1xf32>
    %145 = math.sqrt %144 : vector<2x1xf32>
    %cst_50 = arith.constant 1.000000e+00 : f32
    %146 = vector.broadcast %cst_50 : f32 to vector<2x1xf32>
    %147 = arith.divf %146, %145 : vector<2x1xf32>
    %cst_51 = arith.constant dense<0.000000e+00> : vector<16x1xf32>
    %148 = tpu.matmul %31, %147, %cst_51 {dimension_numbers = #tpu.dot_dimension_numbers<[1], [0], [0], [1], [0, 0, 1, 1], [], []>} : vector<16x2xf32>, vector<2x1xf32>, vector<16x1xf32> -> vector<16x1xf32>
    %149 = vector.broadcast %148 : vector<16x1xf32> to vector<16x8xf32>
    %150 = arith.mulf %137, %149 : vector<16x8xf32>
    %c0_52 = arith.constant 0 : index
    %c0_53 = arith.constant 0 : index
    %151 = vector.load %arg11[%c0_52, %c0_53] : memref<1x8xf32, #tpu.memory_space<vmem>>, vector<1x8xf32>
    %152 = vector.broadcast %151 : vector<1x8xf32> to vector<16x8xf32>
    %153 = arith.mulf %150, %152 : vector<16x8xf32>
    %c0_54 = arith.constant 0 : index
    %c0_55 = arith.constant 0 : index
    %154 = vector.load %arg12[%c0_54, %c0_55] : memref<1x8xf32, #tpu.memory_space<vmem>>, vector<1x8xf32>
    %155 = vector.broadcast %154 : vector<1x8xf32> to vector<16x8xf32>
    %156 = arith.addf %153, %155 : vector<16x8xf32>
    %cst_56 = arith.constant 0.000000e+00 : f32
    %157 = vector.broadcast %cst_56 : f32 to vector<16x8xf32>
    %158 = arith.cmpf ogt, %156, %157 : vector<16x8xf32>
    %cst_57 = arith.constant 0.000000e+00 : f32
    %159 = vector.broadcast %cst_57 : f32 to vector<16x8xf32>
    %160 = arith.minimumf %156, %159 : vector<16x8xf32>
    %161 = math.exp %160 : vector<16x8xf32>
    %cst_58 = arith.constant 1.000000e+00 : f32
    %162 = vector.broadcast %cst_58 : f32 to vector<16x8xf32>
    %163 = arith.subf %161, %162 : vector<16x8xf32>
    %164 = arith.select %158, %156, %163 : vector<16x8xi1>, vector<16x8xf32>
    %cst_59 = arith.constant 0.000000e+00 : f32
    %165 = vector.broadcast %cst_59 : f32 to vector<32x6xf32>
    %166 = arith.cmpf ogt, %54, %165 : vector<32x6xf32>
    %cst_60 = arith.constant 0.000000e+00 : f32
    %167 = vector.broadcast %cst_60 : f32 to vector<32x6xf32>
    %168 = arith.minimumf %54, %167 : vector<32x6xf32>
    %169 = math.exp %168 : vector<32x6xf32>
    %cst_61 = arith.constant 1.000000e+00 : f32
    %170 = vector.broadcast %cst_61 : f32 to vector<32x6xf32>
    %171 = arith.subf %169, %170 : vector<32x6xf32>
    %172 = arith.select %166, %54, %171 : vector<32x6xi1>, vector<32x6xf32>
    %173 = arith.truncf %164 : vector<16x8xf32> to vector<16x8xbf16>
    %c0_62 = arith.constant 0 : index
    %c0_63 = arith.constant 0 : index
    %174 = vector.load %arg13[%c0_62, %c0_63] : memref<8x112xbf16, #tpu.memory_space<vmem>>, vector<8x112xbf16>
    %cst_64 = arith.constant dense<0.000000e+00> : vector<16x112xf32>
    %175 = tpu.matmul %173, %174, %cst_64 {dimension_numbers = #tpu.dot_dimension_numbers<[1], [0], [0], [1], [0, 0, 1, 1], [], []>} : vector<16x8xbf16>, vector<8x112xbf16>, vector<16x112xf32> -> vector<16x112xf32>
    %c0_65 = arith.constant 0 : index
    %c0_66 = arith.constant 0 : index
    %176 = vector.load %arg14[%c0_65, %c0_66] : memref<1x112xf32, #tpu.memory_space<vmem>>, vector<1x112xf32>
    %177 = vector.broadcast %176 : vector<1x112xf32> to vector<16x112xf32>
    %178 = arith.addf %175, %177 : vector<16x112xf32>
    %179 = arith.truncf %172 : vector<32x6xf32> to vector<32x6xbf16>
    %c0_67 = arith.constant 0 : index
    %c0_68 = arith.constant 0 : index
    %180 = vector.load %arg15[%c0_67, %c0_68] : memref<6x36xbf16, #tpu.memory_space<vmem>>, vector<6x36xbf16>
    %cst_69 = arith.constant dense<0.000000e+00> : vector<32x36xf32>
    %181 = tpu.matmul %179, %180, %cst_69 {dimension_numbers = #tpu.dot_dimension_numbers<[1], [0], [0], [1], [0, 0, 1, 1], [], []>} : vector<32x6xbf16>, vector<6x36xbf16>, vector<32x36xf32> -> vector<32x36xf32>
    %c0_70 = arith.constant 0 : index
    %c0_71 = arith.constant 0 : index
    %182 = vector.load %arg16[%c0_70, %c0_71] : memref<1x36xf32, #tpu.memory_space<vmem>>, vector<1x36xf32>
    %183 = vector.broadcast %182 : vector<1x36xf32> to vector<32x36xf32>
    %184 = arith.addf %181, %183 : vector<32x36xf32>
    %185 = vector.extract_strided_slice %178 {offsets = [0, 0], sizes = [16, 32], strides = [1, 1]} : vector<16x112xf32> to vector<16x32xf32>
    %186 = arith.truncf %185 : vector<16x32xf32> to vector<16x32xbf16>
    %187 = vector.extract_strided_slice %178 {offsets = [0, 32], sizes = [16, 64], strides = [1, 1]} : vector<16x112xf32> to vector<16x64xf32>
    %188 = arith.truncf %187 : vector<16x64xf32> to vector<16x64xbf16>
    %189 = vector.extract_strided_slice %178 {offsets = [0, 96], sizes = [16, 16], strides = [1, 1]} : vector<16x112xf32> to vector<16x16xf32>
    %190 = vector.extract_strided_slice %184 {offsets = [0, 0], sizes = [32, 32], strides = [1, 1]} : vector<32x36xf32> to vector<32x32xf32>
    %191 = vector.extract_strided_slice %184 {offsets = [0, 32], sizes = [32, 4], strides = [1, 1]} : vector<32x36xf32> to vector<32x4xf32>
    %cst_72 = arith.constant dense<0.000000e+00> : vector<32x32xf32>
    %192 = tpu.matmul %12, %186, %cst_72 {dimension_numbers = #tpu.dot_dimension_numbers<[1], [0], [0], [1], [0, 0, 1, 1], [], []>} : vector<32x16xbf16>, vector<16x32xbf16>, vector<32x32xf32> -> vector<32x32xf32>
    %cst_73 = arith.constant dense<0.000000e+00> : vector<32x64xf32>
    %193 = tpu.matmul %6, %188, %cst_73 {dimension_numbers = #tpu.dot_dimension_numbers<[1], [0], [0], [1], [0, 0, 1, 1], [], []>} : vector<32x16xbf16>, vector<16x64xbf16>, vector<32x64xf32> -> vector<32x64xf32>
    %194 = vector.extract_strided_slice %193 {offsets = [0, 0], sizes = [32, 32], strides = [1, 1]} : vector<32x64xf32> to vector<32x32xf32>
    %195 = arith.addf %194, %190 : vector<32x32xf32>
    %196 = vector.extract_strided_slice %193 {offsets = [0, 32], sizes = [32, 32], strides = [1, 1]} : vector<32x64xf32> to vector<32x32xf32>
    %197 = arith.addf %196, %190 : vector<32x32xf32>
    %198 = arith.mulf %192, %195 : vector<32x32xf32>
    %cst_74 = arith.constant 2.500000e-01 : f32
    %199 = vector.broadcast %cst_74 : f32 to vector<32x32xf32>
    %200 = arith.mulf %198, %199 : vector<32x32xf32>
    %201 = vector.extract_strided_slice %200 {offsets = [0, 0], sizes = [32, 16], strides = [1, 1]} : vector<32x32xf32> to vector<32x16xf32>
    %cst_75 = arith.constant dense<0.000000e+00> : vector<32xf32>
    %202 = vector.multi_reduction <add>, %201, %cst_75 [1] : vector<32x16xf32> to vector<32xf32>
    %203 = vector.shape_cast %202 : vector<32xf32> to vector<32x1xf32>
    %204 = vector.extract_strided_slice %200 {offsets = [0, 16], sizes = [32, 16], strides = [1, 1]} : vector<32x32xf32> to vector<32x16xf32>
    %cst_76 = arith.constant dense<0.000000e+00> : vector<32xf32>
    %205 = vector.multi_reduction <add>, %204, %cst_76 [1] : vector<32x16xf32> to vector<32xf32>
    %206 = vector.shape_cast %205 : vector<32xf32> to vector<32x1xf32>
    %207 = tpu.concatenate %203, %206 in 1 : vector<32x1xf32>, vector<32x1xf32> -> vector<32x2xf32>
    %208 = vector.extract_strided_slice %207 {offsets = [0, 0], sizes = [32, 1], strides = [1, 1]} : vector<32x2xf32> to vector<32x1xf32>
    %cst_77 = arith.constant 0xFF800000 : f32
    %209 = vector.shape_cast %208 : vector<32x1xf32> to vector<32x1xf32>
    %210 = vector.broadcast %209 : vector<32x1xf32> to vector<32x16xf32>
    %211 = vector.broadcast %cst_77 : f32 to vector<32x16xf32>
    %212 = arith.select %9, %210, %211 : vector<32x16xi1>, vector<32x16xf32>
    %cst_78 = arith.constant dense<0xFF800000> : vector<16xf32>
    %213 = vector.multi_reduction <maximumf>, %212, %cst_78 [0] : vector<32x16xf32> to vector<16xf32>
    %214 = vector.shape_cast %213 : vector<16xf32> to vector<1x16xf32>
    %cst_79 = arith.constant 0.000000e+00 : f32
    %215 = vector.shape_cast %214 : vector<1x16xf32> to vector<1x16xf32>
    %216 = vector.broadcast %215 : vector<1x16xf32> to vector<32x16xf32>
    %217 = vector.broadcast %cst_79 : f32 to vector<32x16xf32>
    %218 = arith.select %9, %216, %217 : vector<32x16xi1>, vector<32x16xf32>
    %cst_80 = arith.constant dense<0.000000e+00> : vector<32xf32>
    %219 = vector.multi_reduction <add>, %218, %cst_80 [1] : vector<32x16xf32> to vector<32xf32>
    %220 = vector.shape_cast %219 : vector<32xf32> to vector<32x1xf32>
    %221 = vector.extract_strided_slice %207 {offsets = [0, 1], sizes = [32, 1], strides = [1, 1]} : vector<32x2xf32> to vector<32x1xf32>
    %cst_81 = arith.constant 0xFF800000 : f32
    %222 = vector.shape_cast %221 : vector<32x1xf32> to vector<32x1xf32>
    %223 = vector.broadcast %222 : vector<32x1xf32> to vector<32x16xf32>
    %224 = vector.broadcast %cst_81 : f32 to vector<32x16xf32>
    %225 = arith.select %9, %223, %224 : vector<32x16xi1>, vector<32x16xf32>
    %cst_82 = arith.constant dense<0xFF800000> : vector<16xf32>
    %226 = vector.multi_reduction <maximumf>, %225, %cst_82 [0] : vector<32x16xf32> to vector<16xf32>
    %227 = vector.shape_cast %226 : vector<16xf32> to vector<1x16xf32>
    %cst_83 = arith.constant 0.000000e+00 : f32
    %228 = vector.shape_cast %227 : vector<1x16xf32> to vector<1x16xf32>
    %229 = vector.broadcast %228 : vector<1x16xf32> to vector<32x16xf32>
    %230 = vector.broadcast %cst_83 : f32 to vector<32x16xf32>
    %231 = arith.select %9, %229, %230 : vector<32x16xi1>, vector<32x16xf32>
    %cst_84 = arith.constant dense<0.000000e+00> : vector<32xf32>
    %232 = vector.multi_reduction <add>, %231, %cst_84 [1] : vector<32x16xf32> to vector<32xf32>
    %233 = vector.shape_cast %232 : vector<32xf32> to vector<32x1xf32>
    %234 = tpu.concatenate %220, %233 in 1 : vector<32x1xf32>, vector<32x1xf32> -> vector<32x2xf32>
    %235 = arith.subf %207, %234 : vector<32x2xf32>
    %236 = math.exp %235 : vector<32x2xf32>
    %237 = arith.truncf %236 : vector<32x2xf32> to vector<32x2xbf16>
    %cst_85 = arith.constant dense<0.000000e+00> : vector<16x2xf32>
    %238 = tpu.matmul %19, %237, %cst_85 {dimension_numbers = #tpu.dot_dimension_numbers<[1], [0], [0], [1], [0, 0, 1, 1], [], []>} : vector<16x32xbf16>, vector<32x2xbf16>, vector<16x2xf32> -> vector<16x2xf32>
    %239 = arith.truncf %238 : vector<16x2xf32> to vector<16x2xbf16>
    %cst_86 = arith.constant dense<0.000000e+00> : vector<32x2xf32>
    %240 = tpu.matmul %12, %239, %cst_86 {dimension_numbers = #tpu.dot_dimension_numbers<[1], [0], [0], [1], [0, 0, 1, 1], [], []>} : vector<32x16xbf16>, vector<16x2xbf16>, vector<32x2xf32> -> vector<32x2xf32>
    %cst_87 = arith.constant 1.000000e-30 : f32
    %241 = vector.broadcast %cst_87 : f32 to vector<32x2xf32>
    %242 = arith.maximumf %240, %241 : vector<32x2xf32>
    %243 = tpu.reciprocal %242 {approx = true} : vector<32x2xf32> -> vector<32x2xf32>
    %244 = arith.mulf %236, %243 : vector<32x2xf32>
    %245 = vector.extract_strided_slice %197 {offsets = [0, 0], sizes = [32, 16], strides = [1, 1]} : vector<32x32xf32> to vector<32x16xf32>
    %246 = vector.extract_strided_slice %244 {offsets = [0, 0], sizes = [32, 1], strides = [1, 1]} : vector<32x2xf32> to vector<32x1xf32>
    %247 = vector.broadcast %246 : vector<32x1xf32> to vector<32x16xf32>
    %248 = arith.mulf %245, %247 : vector<32x16xf32>
    %249 = vector.extract_strided_slice %197 {offsets = [0, 16], sizes = [32, 16], strides = [1, 1]} : vector<32x32xf32> to vector<32x16xf32>
    %250 = vector.extract_strided_slice %244 {offsets = [0, 1], sizes = [32, 1], strides = [1, 1]} : vector<32x2xf32> to vector<32x1xf32>
    %251 = vector.broadcast %250 : vector<32x1xf32> to vector<32x16xf32>
    %252 = arith.mulf %249, %251 : vector<32x16xf32>
    %253 = tpu.concatenate %248, %252 in 1 : vector<32x16xf32>, vector<32x16xf32> -> vector<32x32xf32>
    %254 = arith.truncf %253 : vector<32x32xf32> to vector<32x32xbf16>
    %cst_88 = arith.constant dense<0.000000e+00> : vector<16x32xf32>
    %255 = tpu.matmul %19, %254, %cst_88 {dimension_numbers = #tpu.dot_dimension_numbers<[1], [0], [0], [1], [0, 0, 1, 1], [], []>} : vector<16x32xbf16>, vector<32x32xbf16>, vector<16x32xf32> -> vector<16x32xf32>
    %256 = vector.extract_strided_slice %255 {offsets = [0, 0], sizes = [16, 16], strides = [1, 1]} : vector<16x32xf32> to vector<16x16xf32>
    %cst_89 = arith.constant 5.000000e-01 : f32
    %257 = vector.broadcast %cst_89 : f32 to vector<16x16xf32>
    %258 = arith.mulf %256, %257 : vector<16x16xf32>
    %259 = arith.addf %189, %258 : vector<16x16xf32>
    %260 = vector.extract_strided_slice %255 {offsets = [0, 16], sizes = [16, 16], strides = [1, 1]} : vector<16x32xf32> to vector<16x16xf32>
    %cst_90 = arith.constant 5.000000e-01 : f32
    %261 = vector.broadcast %cst_90 : f32 to vector<16x16xf32>
    %262 = arith.mulf %260, %261 : vector<16x16xf32>
    %263 = arith.addf %259, %262 : vector<16x16xf32>
    %cst_91 = arith.constant 1.000000e+00 : f32
    %264 = vector.broadcast %cst_91 : f32 to vector<2x1xf32>
    %265 = arith.maximumf %33, %264 : vector<2x1xf32>
    %cst_92 = arith.constant 1.600000e+01 : f32
    %266 = vector.broadcast %cst_92 : f32 to vector<2x1xf32>
    %267 = arith.mulf %265, %266 : vector<2x1xf32>
    %cst_93 = arith.constant dense<0.000000e+00> : vector<2x16xf32>
    %268 = tpu.matmul %25, %263, %cst_93 {dimension_numbers = #tpu.dot_dimension_numbers<[1], [0], [0], [1], [0, 0, 1, 1], [], []>} : vector<2x16xf32>, vector<16x16xf32>, vector<2x16xf32> -> vector<2x16xf32>
    %cst_94 = arith.constant dense<0.000000e+00> : vector<2xf32>
    %269 = vector.multi_reduction <add>, %268, %cst_94 [1] : vector<2x16xf32> to vector<2xf32>
    %270 = vector.shape_cast %269 : vector<2xf32> to vector<2x1xf32>
    %271 = arith.divf %270, %267 : vector<2x1xf32>
    %cst_95 = arith.constant dense<0.000000e+00> : vector<16x1xf32>
    %272 = tpu.matmul %31, %271, %cst_95 {dimension_numbers = #tpu.dot_dimension_numbers<[1], [0], [0], [1], [0, 0, 1, 1], [], []>} : vector<16x2xf32>, vector<2x1xf32>, vector<16x1xf32> -> vector<16x1xf32>
    %273 = vector.broadcast %272 : vector<16x1xf32> to vector<16x16xf32>
    %274 = arith.subf %263, %273 : vector<16x16xf32>
    %275 = arith.mulf %274, %274 : vector<16x16xf32>
    %cst_96 = arith.constant dense<0.000000e+00> : vector<2x16xf32>
    %276 = tpu.matmul %25, %275, %cst_96 {dimension_numbers = #tpu.dot_dimension_numbers<[1], [0], [0], [1], [0, 0, 1, 1], [], []>} : vector<2x16xf32>, vector<16x16xf32>, vector<2x16xf32> -> vector<2x16xf32>
    %cst_97 = arith.constant dense<0.000000e+00> : vector<2xf32>
    %277 = vector.multi_reduction <add>, %276, %cst_97 [1] : vector<2x16xf32> to vector<2xf32>
    %278 = vector.shape_cast %277 : vector<2xf32> to vector<2x1xf32>
    %279 = arith.divf %278, %267 : vector<2x1xf32>
    %cst_98 = arith.constant 9.99999974E-6 : f32
    %280 = vector.broadcast %cst_98 : f32 to vector<2x1xf32>
    %281 = arith.addf %279, %280 : vector<2x1xf32>
    %282 = math.sqrt %281 : vector<2x1xf32>
    %cst_99 = arith.constant 1.000000e+00 : f32
    %283 = vector.broadcast %cst_99 : f32 to vector<2x1xf32>
    %284 = arith.divf %283, %282 : vector<2x1xf32>
    %cst_100 = arith.constant dense<0.000000e+00> : vector<16x1xf32>
    %285 = tpu.matmul %31, %284, %cst_100 {dimension_numbers = #tpu.dot_dimension_numbers<[1], [0], [0], [1], [0, 0, 1, 1], [], []>} : vector<16x2xf32>, vector<2x1xf32>, vector<16x1xf32> -> vector<16x1xf32>
    %286 = vector.broadcast %285 : vector<16x1xf32> to vector<16x16xf32>
    %287 = arith.mulf %274, %286 : vector<16x16xf32>
    %c0_101 = arith.constant 0 : index
    %c0_102 = arith.constant 0 : index
    %288 = vector.load %arg17[%c0_101, %c0_102] : memref<1x16xf32, #tpu.memory_space<vmem>>, vector<1x16xf32>
    %289 = vector.broadcast %288 : vector<1x16xf32> to vector<16x16xf32>
    %290 = arith.mulf %287, %289 : vector<16x16xf32>
    %c0_103 = arith.constant 0 : index
    %c0_104 = arith.constant 0 : index
    %291 = vector.load %arg18[%c0_103, %c0_104] : memref<1x16xf32, #tpu.memory_space<vmem>>, vector<1x16xf32>
    %292 = vector.broadcast %291 : vector<1x16xf32> to vector<16x16xf32>
    %293 = arith.addf %290, %292 : vector<16x16xf32>
    %cst_105 = arith.constant 0.000000e+00 : f32
    %294 = vector.broadcast %cst_105 : f32 to vector<16x16xf32>
    %295 = arith.cmpf ogt, %293, %294 : vector<16x16xf32>
    %cst_106 = arith.constant 0.000000e+00 : f32
    %296 = vector.broadcast %cst_106 : f32 to vector<16x16xf32>
    %297 = arith.minimumf %293, %296 : vector<16x16xf32>
    %298 = math.exp %297 : vector<16x16xf32>
    %cst_107 = arith.constant 1.000000e+00 : f32
    %299 = vector.broadcast %cst_107 : f32 to vector<16x16xf32>
    %300 = arith.subf %298, %299 : vector<16x16xf32>
    %301 = arith.select %295, %293, %300 : vector<16x16xi1>, vector<16x16xf32>
    %cst_108 = arith.constant 0.000000e+00 : f32
    %302 = vector.broadcast %cst_108 : f32 to vector<32x4xf32>
    %303 = arith.cmpf ogt, %191, %302 : vector<32x4xf32>
    %cst_109 = arith.constant 0.000000e+00 : f32
    %304 = vector.broadcast %cst_109 : f32 to vector<32x4xf32>
    %305 = arith.minimumf %191, %304 : vector<32x4xf32>
    %306 = math.exp %305 : vector<32x4xf32>
    %cst_110 = arith.constant 1.000000e+00 : f32
    %307 = vector.broadcast %cst_110 : f32 to vector<32x4xf32>
    %308 = arith.subf %306, %307 : vector<32x4xf32>
    %309 = arith.select %303, %191, %308 : vector<32x4xi1>, vector<32x4xf32>
    %c0_111 = arith.constant 0 : index
    %c0_112 = arith.constant 0 : index
    %310 = vector.load %arg19[%c0_111, %c0_112] : memref<16x16xf32, #tpu.memory_space<vmem>>, vector<16x16xf32>
    tpu.vector_store %arg19[%c0_111, %c0_112], %301 {strides = array<i32>} : memref<16x16xf32, #tpu.memory_space<vmem>>, vector<16x16xf32>,
    %c0_113 = arith.constant 0 : index
    %c0_114 = arith.constant 0 : index
    %311 = vector.load %arg20[%c0_113, %c0_114] : memref<32x4xf32, #tpu.memory_space<vmem>>, vector<32x4xf32>
    tpu.vector_store %arg20[%c0_113, %c0_114], %309 {strides = array<i32>} : memref<32x4xf32, #tpu.memory_space<vmem>>, vector<32x4xf32>,
    return
  }
}

</mosaic_0001>

<bundles_post_ra>
// kernel: tpu_custom_call.1
= control target key start
LH: loop header
LB: loop body
LE: loop exit
PB: predicated region body
PF: predicated region fallthrough
CT: control target
= control target key end

     0   :  { %s3710_s0 = inlined_call_operand.vmem [shape: f32[16,8], index: 0, kind: input, shape index: {}]   ;;  %s3711_s1 = inlined_call_operand.vmem [shape: f32[32,6], index: 1, kind: input, shape index: {}]   ;;  %s3712_s2 = inlined_call_operand.vmem [shape: s32[32,1], index: 2, kind: input, shape index: {}]   ;;  %s3713_s3 = inlined_call_operand.vmem [shape: s32[32,1], index: 3, kind: input, shape index: {}]   ;;  %s3714_s4 = inlined_call_operand.vmem [shape: s32[1,32], index: 4, kind: input, shape index: {}]   ;;  %s3715_s5 = inlined_call_operand.vmem [shape: s32[16,1], index: 5, kind: input, shape index: {}]   ;;  %s3716_s6 = inlined_call_operand.vmem [shape: s32[1,16], index: 6, kind: input, shape index: {}]   ;;  %s3717_s7 = inlined_call_operand.vmem [shape: bf16[8,56], index: 7, kind: input, shape index: {}]   ;;  %s3718_s8 = inlined_call_operand.vmem [shape: f32[1,56], index: 8, kind: input, shape index: {}]   ;;  %s3719_s9 = inlined_call_operand.vmem [shape: bf16[6,22], index: 9, kind: input, shape index: {}]   ;;  %s3720_s10 = inlined_call_operand.vmem [shape: f32[1,22], index: 10, kind: input, shape index: {}]   ;;  %s3721_s11 = inlined_call_operand.vmem [shape: f32[1,8], index: 11, kind: input, shape index: {}]   ;;  %s3722_s12 = inlined_call_operand.vmem [shape: f32[1,8], index: 12, kind: input, shape index: {}]   ;;  %s3723_s13 = inlined_call_operand.vmem [shape: bf16[8,112], index: 13, kind: input, shape index: {}]   ;;  %s3724_s14 = inlined_call_operand.vmem [shape: f32[1,112], index: 14, kind: input, shape index: {}]   ;;  %s3725_s15 = inlined_call_operand.vmem [shape: bf16[6,36], index: 15, kind: input, shape index: {}]   ;;  %s3726_s16 = inlined_call_operand.vmem [shape: f32[1,36], index: 16, kind: input, shape index: {}]   ;;  %s3727_s17 = inlined_call_operand.vmem [shape: f32[1,16], index: 17, kind: input, shape index: {}]   ;;  %s3728_s18 = inlined_call_operand.vmem [shape: f32[1,16], index: 18, kind: input, shape index: {}]   ;;  %s3729_s19 = inlined_call_operand.hbm [shape: f32[16,16], index: 19, kind: output, shape index: {0}]   ;;  %s3730_s20 = inlined_call_operand.vmem [shape: f32[32,4], index: 20, kind: output, shape index: {1}]  }
   0x1   :  { %3738 = sst [smem:[#allocation5_spill]] %s3710_s0 }
   0x2   :  { %3739 = sst [smem:[#allocation6_spill]] %s3711_s1 }
   0x3   :  { %3740 = sst [smem:[#allocation7_spill]] %s3712_s2 }
   0x4   :  { %3741 = sst [smem:[#allocation8_spill]] %s3713_s3 }
   0x5   :  { %3742 = sst [smem:[#allocation9_spill]] %s3714_s4 }
   0x6   :  { %v176_v0 = vld [vmem:[%s3717_s7] sm:$0xf]  ;;  %vm188_vm0 = vcmask 1043456   ;;  %v2921_v1 = vmov 0.0   ;;  %s3743_s2 = sld [smem:[#allocation5_spill]]  ;;  %vm2922_vm1 = vmmov 0  }
   0x7   :  { %2577 = vmatprep.subr.bf16.mxu0 %v2921_v1  ;;  %v190_v2 = vsel %vm188_vm0, %v176_v0, 0  ;;  %2579 = vmatprep.mubr.msk.bf16.mxu0 %vm2922_vm1, %v2921_v1  ;;  %vm184_vm2 = vcmask 64512   ;;  %s3744_s27 = sld [smem:[#allocation7_spill]]  ;;  %v2923_v8 = vmov 0  }
   0x8   :  { %2578 = vmatpush3.bf16.msra.mxu0 %v190_v2  ;;  %2748 = vset.pattern.permute.xlu1 %v2923_v8 }
   0x9   :  { %2747 = vset.pattern.permute.xlu0 %v2923_v8 }
   0xc   :  { %v169_v3 = vld [vmem:[%s3743_s2] sm:$0xff]  ;;  %v170_v4 = vld [vmem:[%s3743_s2 + $0x8] sm:$0xff] }
   0xd   :  { %v175_v5 = vpack.c.bf16 %v170_v4, %v169_v3  ;;  %v70_v6 = vld [vmem:[%s3744_s27 + $0x10] sm:$0xff]  ;;  %v68_v7 = vld [vmem:[%s3744_s27] sm:$0xff]  ;;  %v71_v9 = vld [vmem:[%s3744_s27 + $0x18] sm:$0xff] }
   0xe   :  { %79 = vperm.xlu1 %2748, %v70_v6   ;;  %73 = vperm.xlu0 %2747, %v68_v7   ;;  %v69_v10 = vld [vmem:[%s3744_s27 + $0x8] sm:$0xff] }
   0xf   :  { %2580 = vmatmul.mubr.msk.bf16.vlgmr.msra.gmra.mrb[0].mxu0 %vm184_vm2, %v175_v5 }
  0x10   :  { %26 = vsyncpa [#allocation3], 0  ;;  %s3745_s23 = sld [smem:[#allocation8_spill]]  ;;  %v235_v15 = vld [vmem:[%s3719_s9] sm:$0x7]  ;;  %vm250_vm3 = vcmask 1042432   ;;  %v66_v23 = vlaneseq }
  0x11   :  { %s3746_s30 = sld [smem:[#allocation6_spill]]  ;;  %vm243_vm4 = vcmask 48128   ;;  %2729 = vmatprep.subr.msk.bf16.mxu1 %vm250_vm3, %v235_v15  ;;  %v252_v18 = vsel %vm250_vm3, %v235_v15, 0  ;;  %vm304_vm7 = vcmask 130048   ;;  %v2455_v41 = vld [vmem:[%s3718_s8] ss:$0 sm:$0xff] }
  0x12   :  { %82 = vperm.xlu1 %2748, %v71_v9   ;;  %76 = vperm.xlu0 %2747, %v69_v10   ;;  %v3102_v24 = vand.u32 127, %v66_v23  ;;  %s2924_s8 = smov 112   ;;  %v2457_v3 = vld [vmem:[%s3720_s10] ss:$0 sm:$0xff]  ;;  %s2925_s10 = smov 120   ;;  %vm491_vm14 = vcmask 7168  }
  0x13   :  { %2584 = vmatpush3.bf16.msra.mxu1 %v252_v18  ;;  %s3755_s27 = sld [smem:[#allocation9_spill]]  ;;  %s2927_s28 = smov 16  }
  0x14   :  { %s2928_s4 = smov 48   ;;  %s2929_s29 = smov 40  }
  0x16   :  { %v99_v11 = vld [vmem:[%s3745_s23 + $0x8] sm:$0xff]  ;;  %v98_v12 = vld [vmem:[%s3745_s23] sm:$0xff]  ;;  %v101_v13 = vld [vmem:[%s3745_s23 + $0x18] sm:$0xff] }
  0x17   :  { %106 = vperm.xlu1 %2748, %v99_v11   ;;  %103 = vperm.xlu0 %2747, %v98_v12   ;;  %v100_v14 = vld [vmem:[%s3745_s23 + $0x10] sm:$0xff]  ;;  %v171_v16 = vld [vmem:[%s3746_s30] sm:$0xff]  ;;  %v172_v17 = vld [vmem:[%s3746_s30 + $0x8] sm:$0xff] }
  0x18   :  { %v233_v19 = vpack.c.bf16 %v172_v17, %v171_v16  ;;  %v173_v20 = vld [vmem:[%s3746_s30 + $0x10] sm:$0xff]  ;;  %v174_v21 = vld [vmem:[%s3746_s30 + $0x18] sm:$0xff] }
  0x19   :  { %v234_v22 = vpack.c.bf16 %v174_v21, %v173_v20 }
  0x1a   :  { %2585 = vmatprep.mubr.msk.bf16.mxu1 %vm243_vm4, %v233_v19 }
  0x1b   :  { %112 = vperm.xlu1 %2748, %v101_v13   ;;  %109 = vperm.xlu0 %2747, %v100_v14  }
  0x1c   :  { %2586 = vmatmul.mubr.msk.bf16.vlgmr.msra.gmra.mrb[0].mxu1 %vm243_vm4, %v234_v22 }
  0x8d   :  { %v80_v25 = vpop.permute.xlu1 %79  ;;  %v74_v26 = vpop.permute.xlu0 %73 }
  0x8e   :  { %vm84_vm5 = vcmp.eq.s32.totalorder %v3102_v24, %v74_v26  ;;  %vm86_vm12 = vcmp.eq.s32.totalorder %v3102_v24, %v80_v25 }
  0x8f   :  { %v2440_v27 = vsel %vm84_vm5, 1.0, %v2921_v1  ;;  %v2442_v58 = vsel %vm86_vm12, 1.0, %v2921_v1 }
  0x91   :  { %v83_v28 = vpop.permute.xlu1 %82  ;;  %v77_v29 = vpop.permute.xlu0 %76 }
  0x92   :  { %vm85_vm6 = vcmp.eq.s32.totalorder %v3102_v24, %v77_v29  ;;  %vm87_vm13 = vcmp.eq.s32.totalorder %v3102_v24, %v83_v28 }
  0x93   :  { %v2441_v30 = vsel %vm85_vm6, 1.0, %v2921_v1  ;;  %v2443_v59 = vsel %vm87_vm13, 1.0, %v2921_v1  ;;  %vm3736_vm6 = vcmask 261120   ;;  %vm3735_vm13 = vcmask 123904  }
  0x94   :  { %v3108_v31 = vpack.c.bf16 %v2441_v30, %v2440_v27  ;;  %v3169_v61 = vpack.c.bf16 %v2443_v59, %v2442_v58  ;;  %v2926_v59 = vmov 1  }
  0x96   :  { %v107_v32 = vpop.permute.xlu1 %106  ;;  %v104_v33 = vpop.permute.xlu0 %103  ;;  %2597 = vmatprep.mubr.msk.bf16.mxu1 %vm304_vm7, %v3108_v31 }
  0x97   :  { %vm3111_vm8 = vcmp.eq.s32.totalorder %v3102_v24, %v107_v32  ;;  %vm3116_vm9 = vcmp.eq.s32.totalorder %v3102_v24, %v104_v33 }
  0x98   :  { %v2444_v36 = vsel %vm3116_vm9, 1.0, %v2921_v1  ;;  %v2445_v37 = vsel %vm3111_vm8, 1.0, %v2921_v1 }
  0x99   :  { %v3128_v38 = vpack.c.bf16 %v2445_v37, %v2444_v36 }
  0x9a   :  { %v113_v39 = vpop.permute.xlu1 %112  ;;  %v110_v40 = vpop.permute.xlu0 %109 }
  0x9b   :  { %2591 = vmatprep.mubr.msk.bf16.mxu0 %vm304_vm7, %v3128_v38  ;;  %vm3136_vm10 = vcmp.eq.s32.totalorder %v3102_v24, %v113_v39  ;;  %vm3141_vm11 = vcmp.eq.s32.totalorder %v3102_v24, %v110_v40 }
  0x9c   :  { %v2446_v50 = vsel %vm3141_vm11, 1.0, %v2921_v1  ;;  %v2447_v51 = vsel %vm3136_vm10, 1.0, %v2921_v1 }
  0x9d   :  { %v3158_v53 = vpack.c.bf16 %v2447_v51, %v2446_v50 }
  0xe2   :  { %v226_v42 = vpop.f32.mrb[0].mxu0 }
  0xe3   :  { %v2581_v43 = vpop.f32.mrb[1].mxu0  ;;  %v3145_v47 = vadd.f32 %v2455_v41, %v226_v42 }
  0xe4   :  { %v229_v46 = vpop.f32.mrb[2].mxu0 }
  0xe5   :  { %v3147_v48 = vadd.f32 %v2455_v41, %v229_v46  ;;  %v2582_v49 = vpop.f32.mrb[3].mxu0 }
  0xe7   :  { %v303_v52 = vpack.c.bf16 %v3147_v48, %v3145_v47 }
  0xe9   :  { %2589 = vmatprep.subr.bf16.mxu0 %v303_v52  ;;  %361 = vrot.lane.b32.xlu0 %v303_v52, %s2924_s8 }
  0xea   :  { %2590 = vmatpush3.bf16.msra.mxu0 %v303_v52 }
  0xeb   :  { %2601 = vmatprep.subr.bf16.mxu0 %v2921_v1 }
  0xed   :  { %2592 = vmatmul.mubr.msk.bf16.vlgmr.msra.gmra.mrb[4].mxu0 %vm304_vm7, %v3158_v53 }
  0xee   :  { %2605 = vmatprep.mubr.msk.bf16.mxu0 %vm2922_vm1, %v2921_v1 }
  0xef   :  { %v2587_v54 = vpop.f32.mrb[0].mxu1 }
  0xf0   :  { %v288_v55 = vpop.f32.mrb[1].mxu1  ;;  %v3178_v4 = vadd.f32 %v2587_v54, %v2457_v3 }
  0xf1   :  { %v2588_v56 = vpop.f32.mrb[2].mxu1  ;;  %v3180_v5 = vadd.f32 %v2457_v3, %v288_v55 }
  0xf2   :  { %v291_v57 = vpop.f32.mrb[3].mxu1  ;;  %v3184_v7 = vadd.f32 %v2588_v56, %v2457_v3 }
  0xf3   :  { %v3190_v11 = vadd.f32 %v2457_v3, %v291_v57 }
 0x15b   :  { %v362_v60 = vpop.permute.xlu0 %361 }
 0x15c   :  { %2595 = vmatprep.subr.bf16.mxu1 %v362_v60 }
 0x15d   :  { %2596 = vmatpush3.bf16.msra.mxu1 %v362_v60 }
 0x160   :  { %2598 = vmatmul.mubr.msk.bf16.vlgmr.msra.gmra.mrb[4].mxu1 %vm304_vm7, %v3169_v61 }
 0x161   :  { %2611 = vmatprep.mubr.msk.bf16.mxu1 %vm304_vm7, %v3128_v38 }
 0x1c0   :  { %v2593_v62 = vpop.f32.mrb[4].mxu0 }
 0x1c1   :  { %v345_v63 = vpop.f32.mrb[5].mxu0 }
 0x1c2   :  { %v2594_v0 = vpop.f32.mrb[6].mxu0 }
 0x1c3   :  { %v348_v2 = vpop.f32.mrb[7].mxu0 }
 0x233   :  { %v3182_v6 = vpop.f32.mrb[4].mxu1 }
 0x234   :  { %v421_v9 = vadd.f32 %v3182_v6, %v3178_v4  ;;  %v3188_v10 = vpop.f32.mrb[5].mxu1 }
 0x235   :  { %v419_v12 = vadd.f32 %v3188_v10, %v3180_v5  ;;  %v3194_v13 = vpop.f32.mrb[6].mxu1 }
 0x236   :  { %v445_v14 = vmul.f32 %v2593_v62, %v421_v9  ;;  %v422_v15 = vadd.f32 %v3194_v13, %v3184_v7  ;;  %v3198_v16 = vpop.f32.mrb[7].mxu1 }
 0x237   :  { %v443_v17 = vmul.f32 %v419_v12, %v345_v63  ;;  %v420_v18 = vadd.f32 %v3198_v16, %v3190_v11 }
 0x238   :  { %v446_v19 = vmul.f32 %v2594_v0, %v422_v15  ;;  %v449_v25 = vmul.f32 0.35355338, %v445_v14 }
 0x239   :  { %v444_v20 = vmul.f32 %v420_v18, %v348_v2  ;;  %v447_v21 = vmul.f32 0.35355338, %v443_v17 }
 0x23a   :  { %v450_v26 = vmul.f32 0.35355338, %v446_v19  ;;  %v457_v27 = vsel %vm184_vm2, %v449_v25, 0.0 }
 0x23b   :  { %467 = vrot.lane.b32.xlu1 %v447_v21, %s2925_s10  ;;  %v448_v22 = vmul.f32 0.35355338, %v444_v20  ;;  %v451_v28 = vsel %vm184_vm2, %v447_v21, 0.0 }
 0x23c   :  { %v460_v30 = vsel %vm184_vm2, %v450_v26, 0.0 }
 0x23d   :  { %469 = vrot.lane.b32.xlu0 %v448_v22, %s2925_s10  ;;  %v454_v29 = vsel %vm184_vm2, %v448_v22, 0.0 }
 0x23f   :  { %471 = vrot.lane.b32.xlu1 %v449_v25, %s2925_s10 }
 0x241   :  { %473 = vrot.lane.b32.xlu0 %v450_v26, %s2925_s10  ;;  %s2932_s10 = smov 96  }
 0x260   :  { %458 = vadd.xlane.f32.xlu0 %v457_v27 }
 0x263   :  { %452 = vadd.xlane.f32.xlu1 %v451_v28 }
 0x264   :  { %455 = vadd.xlane.f32.xlu0 %v454_v29 }
 0x267   :  { %461 = vadd.xlane.f32.xlu1 %v460_v30 }
 0x2ad   :  { %v468_v32 = vpop.permute.xlu1 %467 }
 0x2ae   :  { %v479_v33 = vsel %vm184_vm2, %v468_v32, 0.0 }
 0x2af   :  { %v470_v36 = vpop.permute.xlu0 %469  ;;  %480 = vadd.xlane.f32.xlu0 %v479_v33 }
 0x2b0   :  { %v482_v37 = vsel %vm184_vm2, %v470_v36, 0.0 }
 0x2b1   :  { %v472_v39 = vpop.permute.xlu1 %471  ;;  %483 = vadd.xlane.f32.xlu1 %v482_v37 }
 0x2b2   :  { %v485_v40 = vsel %vm184_vm2, %v472_v39, 0.0 }
 0x2b3   :  { %v474_v41 = vpop.permute.xlu0 %473  ;;  %486 = vadd.xlane.f32.xlu0 %v485_v40 }
 0x2b4   :  { %v488_v42 = vsel %vm184_vm2, %v474_v41, 0.0 }
 0x2b5   :  { %489 = vadd.xlane.f32.xlu1 %v488_v42 }
 0x2ed   :  { %v459_v43 = vpop.xlane.xlu0 %458 }
 0x2f0   :  { %v453_v46 = vpop.xlane.xlu1 %452 }
 0x2f1   :  { %v456_v49 = vpop.xlane.xlu0 %455 }
 0x2f4   :  { %v462_v50 = vpop.xlane.xlu1 %461 }
 0x33c   :  { %v481_v51 = vpop.xlane.xlu0 %480 }
 0x33d   :  { %v3211_v52 = vsel %vm491_vm14, %v453_v46, %v481_v51 }
 0x33e   :  { %v484_v54 = vpop.xlane.xlu1 %483  ;;  %498 = vperm.xlu0 %2747, %v3211_v52  }
 0x33f   :  { %v3226_v60 = vsel %vm491_vm14, %v456_v49, %v484_v54 }
 0x340   :  { %v487_v55 = vpop.xlane.xlu0 %486 }
 0x341   :  { %v3215_v56 = vsel %vm491_vm14, %v459_v43, %v487_v55 }
 0x342   :  { %v490_v57 = vpop.xlane.xlu1 %489  ;;  %508 = vperm.xlu1 %2748, %v3215_v56  }
 0x343   :  { %v3219_v58 = vsel %vm491_vm14, %v462_v50, %v490_v57 }
 0x344   :  { %513 = vperm.xlu0 %2747, %v3219_v58  }
 0x346   :  { %2749 = vset.pattern.permute.xlu1 %v2926_v59 }
 0x347   :  { %550 = vperm.xlu1 %2749, %v3211_v52  }
 0x348   :  { %2751 = vset.pattern.permute.xlu0 %v2926_v59 }
 0x349   :  { %554 = vperm.xlu0 %2751, %v3226_v60  }
 0x34b   :  { %2750 = vset.pattern.permute.xlu1 %v2923_v8 }
 0x34c   :  { %503 = vperm.xlu1 %2750, %v3226_v60  }
 0x34d   :  { %2754 = vset.pattern.permute.xlu0 %v2923_v8 }
 0x350   :  { %2752 = vset.pattern.permute.xlu1 %v2926_v59 }
 0x351   :  { %558 = vperm.xlu1 %2752, %v3215_v56  }
 0x355   :  { %562 = vperm.xlu1 %2752, %v3219_v58  }
 0x359   :  { %2753 = vset.pattern.permute.xlu1 %v2923_v8 }
 0x3bd   :  { %v499_v62 = vpop.permute.xlu0 %498 }
 0x3be   :  { %v516_v9 = vsel %vm3116_vm9, %v499_v62, -inf }
 0x3bf   :  { %v520_v18 = vsel %vm304_vm7, %v516_v9, -inf }
 0x3c1   :  { %v509_v63 = vpop.permute.xlu1 %508 }
 0x3c2   :  { %v518_v12 = vsel %vm3141_vm11, %v509_v63, -inf }
 0x3c3   :  { %v514_v0 = vpop.permute.xlu0 %513  ;;  %v522_v19 = vsel %vm304_vm7, %v518_v12, -inf }
 0x3c4   :  { %v519_v3 = vsel %vm3136_vm10, %v514_v0, -inf }
 0x3c5   :  { %v523_v14 = vsel %vm304_vm7, %v519_v3, -inf }
 0x3c6   :  { %v551_v2 = vpop.permute.xlu1 %550  ;;  %v525_v21 = vmax.f32 %v522_v19, %v523_v14 }
 0x3c7   :  { %v565_v30 = vsel %vm3116_vm9, %v551_v2, -inf }
 0x3c8   :  { %v555_v22 = vpop.permute.xlu0 %554  ;;  %v569_v40 = vsel %vm304_vm7, %v565_v30, -inf }
 0x3c9   :  { %v566_v28 = vsel %vm3111_vm8, %v555_v22, -inf }
 0x3ca   :  { %v570_v33 = vsel %vm304_vm7, %v566_v28, -inf }
 0x3cb   :  { %v504_v15 = vpop.permute.xlu1 %503  ;;  %v573_v46 = vmax.f32 %v569_v40, %v570_v33 }
 0x3cc   :  { %v517_v17 = vsel %vm3111_vm8, %v504_v15, -inf }
 0x3cd   :  { %v521_v20 = vsel %vm304_vm7, %v517_v17, -inf }
 0x3ce   :  { %v524_v25 = vmax.f32 %v520_v18, %v521_v20 }
 0x3d0   :  { %v526_v26 = vmax.f32 %v524_v25, %v525_v21  ;;  %v559_v27 = vpop.permute.xlu1 %558 }
 0x3d1   :  { %v567_v32 = vsel %vm3141_vm11, %v559_v27, -inf }
 0x3d2   :  { %v527_v29 = vrot.slane %v526_v26, 4  ;;  %v571_v42 = vsel %vm304_vm7, %v567_v32, -inf }
 0x3d4   :  { %v528_v36 = vmax.f32 %v526_v26, %v527_v29  ;;  %v563_v37 = vpop.permute.xlu1 %562 }
 0x3d5   :  { %v568_v39 = vsel %vm3136_vm10, %v563_v37, -inf }
 0x3d6   :  { %v529_v41 = vrot.slane %v528_v36, 2  ;;  %v572_v43 = vsel %vm304_vm7, %v568_v39, -inf }
 0x3d7   :  { %v574_v49 = vmax.f32 %v571_v42, %v572_v43 }
 0x3d8   :  { %v530_v50 = vmax.f32 %v528_v36, %v529_v41 }
 0x3d9   :  { %v575_v51 = vmax.f32 %v573_v46, %v574_v49 }
 0x3da   :  { %v531_v54 = vrot.slane %v530_v50, 1 }
 0x3db   :  { %v576_v55 = vrot.slane %v575_v51, 4 }
 0x3dc   :  { %v532_v57 = vmax.f32 %v530_v50, %v531_v54 }
 0x3dd   :  { %v577_v62 = vmax.f32 %v575_v51, %v576_v55 }
 0x3de   :  { %v534_v63 = vsel %vm3111_vm8, %v532_v57, 0.0  ;;  %v533_v0 = vsel %vm3116_vm9, %v532_v57, 0.0  ;;  %v535_v12 = vsel %vm3141_vm11, %v532_v57, 0.0  ;;  %v536_v27 = vsel %vm3136_vm10, %v532_v57, 0.0 }
 0x3df   :  { %v578_v2 = vrot.slane %v577_v62, 2  ;;  %v540_v3 = vsel %vm304_vm7, %v534_v63, 0.0  ;;  %v537_v9 = vsel %vm304_vm7, %v533_v0, 0.0  ;;  %v543_v15 = vsel %vm304_vm7, %v535_v12, 0.0 }
 0x3e0   :  { %541 = vadd.xlane.f32.xlu1 %v540_v3  ;;  %538 = vadd.xlane.f32.xlu0 %v537_v9  ;;  %v546_v28 = vsel %vm304_vm7, %v536_v27, 0.0 }
 0x3e1   :  { %v579_v14 = vmax.f32 %v577_v62, %v578_v2  ;;  %v3293_v2 = vshrl.u32 %v66_v23, 7 }
 0x3e3   :  { %v580_v17 = vrot.slane %v579_v14, 1  ;;  %v130_v9 = vadd.s32 8, %v3293_v2 }
 0x3e4   :  { %544 = vadd.xlane.f32.xlu1 %v543_v15 }
 0x3e5   :  { %v581_v18 = vmax.f32 %v579_v14, %v580_v17 }
 0x3e7   :  { %v584_v19 = vsel %vm3141_vm11, %v581_v18, 0.0  ;;  %v582_v20 = vsel %vm3116_vm9, %v581_v18, 0.0  ;;  %v583_v25 = vsel %vm3111_vm8, %v581_v18, 0.0  ;;  %v585_v29 = vsel %vm3136_vm10, %v581_v18, 0.0 }
 0x3e8   :  { %v592_v21 = vsel %vm304_vm7, %v584_v19, 0.0  ;;  %v586_v22 = vsel %vm304_vm7, %v582_v20, 0.0  ;;  %v589_v26 = vsel %vm304_vm7, %v583_v25, 0.0  ;;  %v595_v30 = vsel %vm304_vm7, %v585_v29, 0.0 }
 0x3e9   :  { %593 = vadd.xlane.f32.xlu1 %v592_v21  ;;  %587 = vadd.xlane.f32.xlu0 %v586_v22 }
 0x3ed   :  { %590 = vadd.xlane.f32.xlu0 %v589_v26 }
 0x3f1   :  { %547 = vadd.xlane.f32.xlu0 %v546_v28 }
 0x3f5   :  { %596 = vadd.xlane.f32.xlu0 %v595_v30 }
 0x46d   :  { %v542_v32 = vpop.xlane.xlu1 %541  ;;  %v539_v33 = vpop.xlane.xlu0 %538 }
 0x471   :  { %v545_v36 = vpop.xlane.xlu1 %544 }
 0x476   :  { %v588_v37 = vpop.xlane.xlu0 %587  ;;  %v594_v41 = vpop.xlane.xlu1 %593 }
 0x477   :  { %v598_v39 = vsel %vm491_vm14, %v539_v33, %v588_v37  ;;  %v600_v49 = vsel %vm491_vm14, %v545_v36, %v594_v41 }
 0x478   :  { %v602_v40 = vsub.f32 %v3211_v52, %v598_v39  ;;  %v604_v55 = vsub.f32 %v3215_v56, %v600_v49  ;;  %v2448_v56 = vld [vmem:[%s3755_s27] ss:$0 sm:$0xff] }
 0x479   :  { %vm136_vm15 = vcmp.eq.s32.totalorder %v3293_v2, %v2448_v56  ;;  %vm137_vm5 = vcmp.eq.s32.totalorder %v130_v9, %v2448_v56 }
 0x47a   :  { %v591_v42 = vpop.xlane.xlu0 %590  ;;  %v606_v43 = vmul.f32 1.442695, %v602_v40  ;;  %v610_v62 = vmul.f32 1.442695, %v604_v55  ;;  %v2449_v23 = vsel %vm136_vm15, 1.0, %v2921_v1  ;;  %v2450_v14 = vsel %vm137_vm5, 1.0, %v2921_v1 }
 0x47b   :  { %v599_v46 = vsel %vm491_vm14, %v542_v32, %v591_v42  ;;  %v3303_v18 = vpack.c.bf16 %v2450_v14, %v2449_v23  ;;  %vm949_vm15 = vcmask 58368   ;;  %vm3737_vm5 = vcmask 1041408  }
 0x47c   :  { %v603_v50 = vsub.f32 %v3226_v60, %v599_v46  ;;  %2829 = vpow2.f32 %v606_v43 }
 0x47e   :  { %v608_v51 = vmul.f32 1.442695, %v603_v50  ;;  %v548_v54 = vpop.xlane.xlu0 %547 }
 0x480   :  { %2831 = vpow2.f32 %v608_v51 }
 0x481   :  { %2833 = vpow2.f32 %v610_v62 }
 0x482   :  { %v597_v57 = vpop.xlane.xlu0 %596 }
 0x483   :  { %v601_v63 = vsel %vm491_vm14, %v548_v54, %v597_v57 }
 0x484   :  { %v605_v52 = vsub.f32 %v3219_v58, %v601_v63 }
 0x486   :  { %v612_v0 = vmul.f32 1.442695, %v605_v52  ;;  %v2830_v3 = vpop.eup %2829 }
 0x488   :  { %2835 = vpow2.f32 %v612_v0 }
 0x48a   :  { %v2832_v60 = vpop.eup %2831 }
 0x48b   :  { %v614_v12 = vpack.c.bf16 %v2832_v60, %v2830_v3  ;;  %v2834_v58 = vpop.eup %2833 }
 0x48d   :  { %2602 = vmatpush3.bf16.msra.mxu0 %v614_v12 }
 0x48e   :  { %2603 = vmatprep.subr.bf16.mxu0 %v2921_v1 }
 0x492   :  { %v2836_v15 = vpop.eup %2835 }
 0x493   :  { %v615_v17 = vpack.c.bf16 %v2836_v15, %v2834_v58 }
 0x495   :  { %2604 = vmatpush3.bf16.msra.mxu0 %v615_v17 }
 0x496   :  { %2615 = vmatprep.subr.bf16.mxu0 %v2921_v1 }
 0x498   :  { %2606 = vmatmul.mubr.msk.bf16.vlgmr.msra.gmra.mrb[8].mxu0 %vm3736_vm6, %v3303_v18 }
 0x499   :  { %2619 = vmatprep.mubr.msk.bf16.mxu0 %vm2922_vm1, %v2921_v1 }
 0x56b   :  { %v654_v19 = vpop.f32.mrb[8].mxu0 }
 0x56c   :  { %v2607_v20 = vpop.f32.mrb[9].mxu0 }
 0x56d   :  { %v657_v21 = vpop.f32.mrb[10].mxu0 }
 0x56e   :  { %v661_v22 = vpack.c.bf16 %v657_v21, %v654_v19  ;;  %v2608_v25 = vpop.f32.mrb[11].mxu0 }
 0x570   :  { %2609 = vmatprep.subr.bf16.mxu1 %v661_v22 }
 0x571   :  { %2610 = vmatpush3.bf16.msra.mxu1 %v661_v22 }
 0x574   :  { %2612 = vmatmul.mubr.msk.bf16.vlgmr.msra.gmra.mrb[8].mxu1 %vm304_vm7, %v3158_v53 }
 0x575   :  { %2627 = vmatprep.mubr.msk.f32.mxu1 %vm2922_vm1, %v2921_v1 }
 0x647   :  { %v2613_v26 = vpop.f32.mrb[8].mxu1 }
 0x648   :  { %v696_v27 = vpop.f32.mrb[9].mxu1  ;;  %v713_v33 = vmax.f32 %v2613_v26, 1e-30 }
 0x649   :  { %v711_v28 = vmax.f32 %v696_v27, 1e-30  ;;  %v2614_v29 = vpop.f32.mrb[10].mxu1 }
 0x64a   :  { %v699_v30 = vpop.f32.mrb[11].mxu1  ;;  %v714_v36 = vmax.f32 %v2614_v29, 1e-30 }
 0x64b   :  { %2837 = vrcp.f32 %v711_v28  ;;  %v712_v32 = vmax.f32 %v699_v30, 1e-30 }
 0x64d   :  { %2839 = vrcp.f32 %v712_v32 }
 0x64e   :  { %2841 = vrcp.f32 %v713_v33 }
 0x64f   :  { %2843 = vrcp.f32 %v714_v36 }
 0x655   :  { %v2838_v37 = vpop.eup %2837 }
 0x656   :  { %v719_v39 = vmul.f32 %v2838_v37, %v2830_v3 }
 0x657   :  { %v2840_v40 = vpop.eup %2839 }
 0x658   :  { %725 = vperm.xlu1 %2753, %v719_v39   ;;  %v720_v41 = vmul.f32 %v2840_v40, %v2832_v60  ;;  %v2842_v42 = vpop.eup %2841 }
 0x659   :  { %v721_v43 = vmul.f32 %v2842_v42, %v2834_v58  ;;  %v2844_v46 = vpop.eup %2843 }
 0x65a   :  { %730 = vperm.xlu0 %2754, %v720_v41   ;;  %v722_v49 = vmul.f32 %v2844_v46, %v2836_v15 }
 0x65c   :  { %2755 = vset.pattern.permute.xlu1 %v2926_v59 }
 0x65d   :  { %748 = vperm.xlu1 %2755, %v719_v39  }
 0x65e   :  { %431 = vrot.lane.b32.xlu0 %v3178_v4, %s2927_s28 }
 0x661   :  { %2756 = vset.pattern.permute.xlu1 %v2923_v8 }
 0x662   :  { %735 = vperm.xlu1 %2756, %v721_v43  }
 0x666   :  { %740 = vperm.xlu1 %2756, %v722_v49  }
 0x66a   :  { %2757 = vset.pattern.permute.xlu1 %v2926_v59 }
 0x66b   :  { %756 = vperm.xlu1 %2757, %v721_v43  }
 0x66f   :  { %760 = vperm.xlu1 %2757, %v722_v49  }
 0x673   :  { %752 = vperm.xlu1 %2757, %v720_v41  }
 0x677   :  { %427 = vrot.lane.b32.xlu1 %v3180_v5, %s2927_s28 }
 0x678   :  { %2783 = vset.pattern.permute.xlu1 %v2923_v8 }
 0x67b   :  { %429 = vrot.lane.b32.xlu1 %v3190_v11, %s2927_s28 }
 0x67f   :  { %433 = vrot.lane.b32.xlu1 %v3184_v7, %s2927_s28 }
 0x6d7   :  { %v726_v50 = vpop.permute.xlu1 %725 }
 0x6d9   :  { %v731_v52 = vpop.permute.xlu0 %730 }
 0x6dc   :  { %v749_v51 = vpop.permute.xlu1 %748 }
 0x6dd   :  { %v432_v9 = vpop.permute.xlu0 %431 }
 0x6de   :  { %v441_v15 = vadd.f32 %v3182_v6, %v432_v9  ;;  %v2451_v9 = vld [vmem:[%s3716_s6] ss:$0 sm:$0xff]  ;;  %s2931_s6 = smov 80  }
 0x6df   :  { %vm148_vm12 = vcmp.eq.s32.totalorder %v3293_v2, %v2451_v9 }
 0x6e1   :  { %v736_v54 = vpop.permute.xlu1 %735 }
 0x6e2   :  { %v745_v22 = vmul.f32 %v736_v54, %v441_v15 }
 0x6e5   :  { %v741_v55 = vpop.permute.xlu1 %740 }
 0x6ea   :  { %v757_v57 = vpop.permute.xlu1 %756 }
 0x6eb   :  { %v765_v25 = vmul.f32 %v757_v57, %v441_v15 }
 0x6ee   :  { %v761_v62 = vpop.permute.xlu1 %760 }
 0x6f2   :  { %v753_v63 = vpop.permute.xlu1 %752 }
 0x6f6   :  { %v428_v0 = vpop.permute.xlu1 %427 }
 0x6f7   :  { %v439_v3 = vadd.f32 %v428_v0, %v3188_v10 }
 0x6f9   :  { %v743_v56 = vmul.f32 %v726_v50, %v439_v3  ;;  %v763_v58 = vmul.f32 %v749_v51, %v439_v3  ;;  %v2930_v3 = vmov 0.0|0.0  }
 0x6fa   :  { %v430_v60 = vpop.permute.xlu1 %429  ;;  %2717 = vmatprep.subr.bf16.mxu1 %v2930_v3 }
 0x6fb   :  { %v440_v12 = vadd.f32 %v430_v60, %v3198_v16 }
 0x6fd   :  { %v744_v23 = vmul.f32 %v731_v52, %v440_v12  ;;  %v764_v14 = vmul.f32 %v753_v63, %v440_v12 }
 0x6fe   :  { %v434_v17 = vpop.permute.xlu1 %433 }
 0x6ff   :  { %v442_v19 = vadd.f32 %v3194_v13, %v434_v17  ;;  %v2768_v20 = vpack.i.bf16 %v764_v14, %v763_v58  ;;  %v2758_v21 = vpack.i.bf16 %v744_v23, %v743_v56  ;;  %v3350_v23 = vsel %vm148_vm12, 1.0, %v2921_v1 }
 0x700   :  { %v166_v15 = vsel %vm3735_vm13, %v3350_v23, 0.0  ;;  %vm955_vm13 = vcmask 15360  }
 0x701   :  { %v746_v26 = vmul.f32 %v741_v55, %v442_v19  ;;  %v766_v27 = vmul.f32 %v761_v62, %v442_v19  ;;  %2769 = vrot.lane.b32.xlu1 %v2768_v20, %s2924_s8  ;;  %2759 = vrot.lane.b32.xlu0 %v2758_v21, %s2924_s8 }
 0x703   :  { %v2773_v10 = vpack.i.bf16 %v766_v27, %v765_v25  ;;  %v2763_v16 = vpack.i.bf16 %v746_v26, %v745_v22 }
 0x705   :  { %2774 = vrot.lane.b32.xlu1 %v2773_v10, %s2924_s8  ;;  %2764 = vrot.lane.b32.xlu0 %v2763_v16, %s2924_s8  ;;  %v151_v10 = vld [vmem:[%s3715_s5] sm:$0xff] }
 0x773   :  { %v2770_v6 = vpop.permute.xlu1 %2769  ;;  %v2760_v28 = vpop.permute.xlu0 %2759 }
 0x774   :  { %v2772_v29 = vunpack.i.h.bf16 %v2770_v6  ;;  %v2771_v13 = vunpack.i.l.bf16 %v2770_v6  ;;  %v2762_v30 = vunpack.i.h.bf16 %v2760_v28  ;;  %v2761_v32 = vunpack.i.l.bf16 %v2760_v28 }
 0x776   :  { %v800_v33 = vsel %vm184_vm2, %v2762_v30, %v2772_v29  ;;  %v799_v36 = vsel %vm184_vm2, %v2761_v32, %v2771_v13 }
 0x777   :  { %v803_v37 = vpack.c.bf16 %v800_v33, %v799_v36  ;;  %v2775_v39 = vpop.permute.xlu1 %2774  ;;  %v2765_v40 = vpop.permute.xlu0 %2764 }
 0x778   :  { %v2777_v41 = vunpack.i.h.bf16 %v2775_v39  ;;  %v2776_v42 = vunpack.i.l.bf16 %v2775_v39  ;;  %v2767_v43 = vunpack.i.h.bf16 %v2765_v40  ;;  %v2766_v46 = vunpack.i.l.bf16 %v2765_v40 }
 0x779   :  { %2616 = vmatpush3.bf16.msra.mxu0 %v803_v37 }
 0x77a   :  { %v802_v49 = vsel %vm184_vm2, %v2767_v43, %v2777_v41  ;;  %v801_v50 = vsel %vm184_vm2, %v2766_v46, %v2776_v42  ;;  %2617 = vmatprep.subr.bf16.mxu0 %v2921_v1 }
 0x77b   :  { %v804_v51 = vpack.c.bf16 %v802_v49, %v801_v50 }
 0x77d   :  { %2618 = vmatpush3.bf16.msra.mxu0 %v804_v51 }
 0x77e   :  { %2720 = vmatprep.subr.bf16.mxu0 %v2930_v3 }
 0x780   :  { %2620 = vmatmul.mubr.msk.bf16.vlgmr.msra.gmra.mrb[12].mxu0 %vm3736_vm6, %v3303_v18 }
 0x781   :  { %2639 = vmatprep.mubr.msk.f32.mxu0 %vm2922_vm1, %v2921_v1 }
 0x853   :  { %v839_v54 = vpop.f32.mrb[12].mxu0 }
 0x854   :  { %v846_v55 = vmul.f32 0.5, %v839_v54  ;;  %v2621_v57 = vpop.f32.mrb[13].mxu0 }
 0x855   :  { %v842_v62 = vpop.f32.mrb[14].mxu0  ;;  %v1296_v57 = vld [vmem:[%s3723_s13] sm:$0xf] }
 0x856   :  { %v847_v63 = vmul.f32 0.5, %v842_v62  ;;  %850 = vrot.lane.b32.xlu0 %v846_v55, %s2928_s4  ;;  %v2622_v52 = vpop.f32.mrb[15].mxu0 }
 0x858   :  { %852 = vrot.lane.b32.xlu1 %v847_v63, %s2928_s4 }
 0x85a   :  { %858 = vrot.lane.b32.xlu0 %v846_v55, %s2929_s29 }
 0x85c   :  { %860 = vrot.lane.b32.xlu1 %v847_v63, %s2929_s29  ;;  %v1311_v63 = vsel %vm188_vm0, %v1296_v57, 0 }
 0x880   :  { %167 = vadd.xlane.f32.xlu1 %v166_v15 }
 0x8c8   :  { %v851_v0 = vpop.permute.xlu0 %850 }
 0x8c9   :  { %v856_v56 = vadd.f32 %v851_v0, %v3145_v47 }
 0x8ca   :  { %v853_v60 = vpop.permute.xlu1 %852 }
 0x8cb   :  { %v857_v58 = vadd.f32 %v853_v60, %v3147_v48  ;;  %v152_v48 = vld [vmem:[%s3715_s5 + $0x8] sm:$0xff] }
 0x8cc   :  { %v859_v12 = vpop.permute.xlu0 %858  ;;  %157 = vperm.xlu1 %2783, %v152_v48  }
 0x8cd   :  { %v864_v17 = vadd.f32 %v859_v12, %v856_v56 }
 0x8ce   :  { %v861_v14 = vpop.permute.xlu1 %860 }
 0x8cf   :  { %v865_v19 = vadd.f32 %v861_v14, %v857_v58 }
 0x8d1   :  { %v2778_v20 = vpack.i.bf16 %v865_v19, %v864_v17 }
 0x8d3   :  { %2779 = vrot.lane.b32.xlu0 %v2778_v20, %s2931_s6 }
 0x90d   :  { %v3364_v16 = vpop.xlane.xlu1 %167 }
 0x90e   :  { %v866_v6 = vmax.f32 %v3364_v16, 1.0 }
 0x910   :  { %v867_v28 = vmul.f32 8.0, %v866_v6 }
 0x912   :  { %2845 = vrcp.f32 %v867_v28 }
 0x91c   :  { %v2846_v29 = vpop.eup %2845 }
 0x945   :  { %v2780_v2 = vpop.permute.xlu0 %2779 }
 0x946   :  { %v2782_v21 = vunpack.i.h.bf16 %v2780_v2  ;;  %v2781_v47 = vunpack.i.l.bf16 %v2780_v2 }
 0x948   :  { %v2718_v22 = vpack.c.bf16 %v2782_v21, %v2781_v47  ;;  %v2476_v47 = vld [vmem:[%s3721_s11] ss:$0 sm:$0xff] }
 0x94a   :  { %2719 = vmatpush3.bf16.msra.mxu1 %v2718_v22  ;;  %v2477_v22 = vld [vmem:[%s3722_s12] ss:$0 sm:$0xff] }
 0x94b   :  { %v158_v32 = vpop.permute.xlu1 %157 }
 0x94c   :  { %vm160_vm12 = vcmp.eq.s32.totalorder %v3102_v24, %v158_v32 }
 0x94d   :  { %2628 = vmatmul.mubr.msk.f32.vlgmr.msra.gmra.mrb[12].mxu1 %vm304_vm7, %v3350_v23  ;;  %v3374_v36 = vsel %vm160_vm12, 1.0, %v2921_v1 }
 0xa20   :  { %v945_v25 = vpop.f32.mrb[12].mxu1 }
 0xa21   :  { %v2629_v26 = vpop.f32.mrb[13].mxu1  ;;  %v950_v27 = vsel %vm949_vm15, %v945_v25, 0.0 }
 0xa22   :  { %951 = vadd.xlane.f32.xlu0 %v950_v27  ;;  %v1275_v27 = vmin.f32 %v3180_v5, 0.0 }
 0xa38   :  { %154 = vperm.xlu0 %2754, %v151_v10  }
 0xaaf   :  { %v952_v13 = vpop.xlane.xlu0 %951 }
 0xab0   :  { %v954_v30 = vmul.f32 %v2846_v29, %v952_v13 }
 0xab2   :  { %2630 = vmatprep.subr.msk.mxu1 %vm3737_vm5, %v954_v30 }
 0xab3   :  { %2631 = vmatpush3.msk.msra.mxu1 %vm3737_vm5, %v954_v30 }
 0xab7   :  { %v155_v33 = vpop.permute.xlu0 %154 }
 0xab8   :  { %vm159_vm6 = vcmp.eq.s32.totalorder %v3102_v24, %v155_v33  ;;  %v1277_v33 = vmin.f32 %v3178_v4, 0.0 }
 0xab9   :  { %v3377_v37 = vsel %vm159_vm6, 1.0, %v2921_v1 }
 0xaba   :  { %2632 = vmatprep.mubr.msk.f32.mxu1 %vm955_vm13, %v3377_v37 }
 0xabb   :  { %2633 = vmatmul.mubr.msk.f32.vlgmr.msra.gmra.mrb[14].mxu1 %vm955_vm13, %v3374_v36 }
 0xabc   :  { %2644 = vmatprep.mubr.msk.f32.mxu1 %vm955_vm13, %v3377_v37 }
 0xb8e   :  { %v2634_v39 = vpop.f32.mrb[14].mxu1 }
 0xb8f   :  { %1048 = vperm.xlu0 %2754, %v2634_v39   ;;  %v1032_v40 = vpop.f32.mrb[15].mxu1 }
 0xb90   :  { %1043 = vperm.xlu1 %2783, %v1032_v40  }
 0xb93   :  { %2789 = vset.pattern.permute.xlu0 %v2926_v59 }
 0xc0e   :  { %v1049_v24 = vpop.permute.xlu0 %1048 }
 0xc0f   :  { %v1052_v41 = vsub.f32 %v865_v19, %v1049_v24  ;;  %v1044_v42 = vpop.permute.xlu1 %1043  ;;  %v1279_v24 = vmul.f32 1.442695, %v1275_v27 }
 0xc10   :  { %v1051_v43 = vsub.f32 %v864_v17, %v1044_v42  ;;  %v1278_v42 = vmin.f32 %v3184_v7, 0.0 }
 0xc11   :  { %v1054_v46 = vmul.f32 %v1052_v41, %v1052_v41 }
 0xc12   :  { %v1053_v49 = vmul.f32 %v1051_v43, %v1051_v43 }
 0xc14   :  { %v2784_v50 = vpack.i.bf16 %v1054_v46, %v1053_v49 }
 0xc16   :  { %2785 = vrot.lane.b32.xlu1 %v2784_v50, %s2931_s6 }
 0xc88   :  { %v2786_v51 = vpop.permute.xlu1 %2785 }
 0xc89   :  { %v2788_v54 = vunpack.i.h.bf16 %v2786_v51  ;;  %v2787_v55 = vunpack.i.l.bf16 %v2786_v51 }
 0xc8b   :  { %v2721_v62 = vpack.c.bf16 %v2788_v54, %v2787_v55  ;;  %v1356_v55 = vld [vmem:[%s3725_s15] sm:$0x7] }
 0xc8d   :  { %2722 = vmatpush3.bf16.msra.mxu0 %v2721_v62  ;;  %v1377_v62 = vsel %vm250_vm3, %v1356_v55, 0 }
 0xc8e   :  { %2647 = vmatprep.subr.bf16.mxu0 %v2921_v1 }
 0xc90   :  { %2640 = vmatmul.mubr.msk.f32.vlgmr.msra.gmra.mrb[16].mxu0 %vm304_vm7, %v3350_v23 }
 0xc91   :  { %2648 = vmatpush3.bf16.msra.mxu0 %v1311_v63  ;;  %2649 = vmatprep.mubr.msk.bf16.mxu0 %vm2922_vm1, %v2921_v1 }
 0xd63   :  { %v1129_v52 = vpop.f32.mrb[16].mxu0 }
 0xd64   :  { %v2641_v0 = vpop.f32.mrb[17].mxu0  ;;  %v1133_v60 = vsel %vm949_vm15, %v1129_v52, 0.0 }
 0xd65   :  { %1134 = vadd.xlane.f32.xlu0 %v1133_v60 }
 0xdf2   :  { %v1135_v9 = vpop.xlane.xlu0 %1134 }
 0xdf3   :  { %v1136_v12 = vmul.f32 %v2846_v29, %v1135_v9  ;;  %v1276_v29 = vmin.f32 %v3190_v11, 0.0 }
 0xdf5   :  { %v1137_v56 = vadd.f32 1e-05, %v1136_v12  ;;  %v1281_v46 = vmul.f32 1.442695, %v1276_v29 }
 0xdf7   :  { %2847 = vrsqrt.f32 %v1137_v56  ;;  %vm1140_vm0 = vcmp.eq.f32.partialorder %v1137_v56, inf  ;;  %v1143_v15 = vand.u32 2147483648, %v1137_v56  ;;  %vm1142_vm6 = vcmp.eq.f32.partialorder %v1137_v56, 0.0 }
 0xe01   :  { %v2848_v58 = vpop.eup %2847 }
 0xe02   :  { %v1139_v14 = vmul.f32 %v2848_v58, %v1137_v56 }
 0xe04   :  { %v1141_v17 = vsel %vm1140_vm0, %v1137_v56, %v1139_v14  ;;  %vm1271_vm0 = vcmp.gt.f32.partialorder %v3180_v5, 0.0 }
 0xe05   :  { %v1144_v19 = vsel %vm1142_vm6, %v1143_v15, %v1141_v17  ;;  %vm1272_vm6 = vcmp.gt.f32.partialorder %v3190_v11, 0.0 }
 0xe06   :  { %2849 = vrcp.f32 %v1144_v19 }
 0xe07   :  { %2851 = vpow2.f32 %v1279_v24 }
 0xe08   :  { %2853 = vpow2.f32 %v1281_v46 }
 0xe10   :  { %v2850_v20 = vpop.eup %2849 }
 0xe11   :  { %2642 = vmatprep.subr.msk.mxu1 %vm3737_vm5, %v2850_v20  ;;  %v2852_v57 = vpop.eup %2851 }
 0xe12   :  { %2643 = vmatpush3.msk.msra.mxu1 %vm3737_vm5, %v2850_v20  ;;  %v2854_v63 = vpop.eup %2853  ;;  %v2480_v56 = vadd.f32 -1.0, %v2852_v57  ;;  %vm1274_vm5 = vcmp.gt.f32.partialorder %v3184_v7, 0.0 }
 0xe13   :  { %2645 = vmatmul.mubr.msk.f32.vlgmr.msra.gmra.mrb[16].mxu1 %vm955_vm13, %v3374_v36  ;;  %2730 = vmatprep.subr.msk.bf16.mxu1 %vm250_vm3, %v1356_v55  ;;  %v2481_v58 = vadd.f32 -1.0, %v2854_v63  ;;  %vm1273_vm3 = vcmp.gt.f32.partialorder %v3178_v4, 0.0 }
 0xe14   :  { %2654 = vmatpush3.bf16.msra.mxu1 %v1377_v62  ;;  %v1291_v20 = vsel %vm1271_vm0, %v3180_v5, %v2480_v56 }
 0xee6   :  { %v2646_v2 = vpop.f32.mrb[16].mxu1 }
 0xee7   :  { %v1216_v21 = vpop.f32.mrb[17].mxu1 }
 0xee8   :  { %1227 = vperm.xlu1 %2783, %v1216_v21  }
 0xeec   :  { %1232 = vperm.xlu1 %2783, %v2646_v2   ;;  %v1292_v2 = vsel %vm1272_vm6, %v3190_v11, %v2481_v58  ;;  %vm2415_vm6 = vcmask 31744  }
 0xef0   :  { %1243 = vrot.lane.b32.xlu1 %v2476_v47, %s2928_s4 }
 0xef4   :  { %1254 = vrot.lane.b32.xlu1 %v2477_v22, %s2928_s4  ;;  %v1354_v22 = vpack.c.bf16 %v1292_v2, %v1291_v20 }
 0xf67   :  { %v1228_v48 = vpop.permute.xlu1 %1227 }
 0xf68   :  { %v1235_v10 = vmul.f32 %v1228_v48, %v1051_v43  ;;  %v1283_v43 = vmul.f32 1.442695, %v1277_v33 }
 0xf6b   :  { %v1233_v25 = vpop.permute.xlu1 %1232 }
 0xf6c   :  { %v1236_v28 = vmul.f32 %v1233_v25, %v1052_v41  ;;  %v1285_v41 = vmul.f32 1.442695, %v1278_v42 }
 0xf6f   :  { %v1244_v26 = vpop.permute.xlu1 %1243 }
 0xf70   :  { %v1246_v13 = vmul.f32 %v1244_v26, %v1235_v10  ;;  %v1247_v30 = vmul.f32 %v1244_v26, %v1236_v28 }
 0xf73   :  { %v1255_v32 = vpop.permute.xlu1 %1254 }
 0xf74   :  { %v1257_v39 = vadd.f32 %v1255_v32, %v1246_v13  ;;  %v1258_v40 = vadd.f32 %v1255_v32, %v1247_v30 }
 0xf76   :  { %v1261_v49 = vmin.f32 %v1257_v39, 0.0  ;;  %v1262_v50 = vmin.f32 %v1258_v40, 0.0  ;;  %vm1259_vm15 = vcmp.gt.f32.partialorder %v1257_v39, 0.0  ;;  %vm1260_vm12 = vcmp.gt.f32.partialorder %v1258_v40, 0.0 }
 0xf78   :  { %v1263_v51 = vmul.f32 1.442695, %v1261_v49  ;;  %v1265_v54 = vmul.f32 1.442695, %v1262_v50 }
 0xf7a   :  { %2855 = vpow2.f32 %v1263_v51  ;;  %v2486_v51 = vld [vmem:[%s3726_s16] ss:$0 sm:$0xff]  ;;  %s2933_s16 = smov 32  }
 0xf7b   :  { %2857 = vpow2.f32 %v1265_v54 }
 0xf7c   :  { %2859 = vpow2.f32 %v1283_v43 }
 0xf7d   :  { %2861 = vpow2.f32 %v1285_v41 }
 0xf84   :  { %v2856_v52 = vpop.eup %2855 }
 0xf85   :  { %v2858_v0 = vpop.eup %2857  ;;  %v2478_v60 = vadd.f32 -1.0, %v2856_v52 }
 0xf86   :  { %v2860_v9 = vpop.eup %2859  ;;  %v2479_v12 = vadd.f32 -1.0, %v2858_v0 }
 0xf87   :  { %v2862_v14 = vpop.eup %2861  ;;  %v1269_v15 = vsel %vm1259_vm15, %v1257_v39, %v2478_v60  ;;  %v2482_v21 = vadd.f32 -1.0, %v2860_v9 }
 0xf88   :  { %v1270_v17 = vsel %vm1260_vm12, %v1258_v40, %v2479_v12  ;;  %v2483_v47 = vadd.f32 -1.0, %v2862_v14 }
 0xf89   :  { %v1295_v19 = vpack.c.bf16 %v1270_v17, %v1269_v15  ;;  %v1293_v48 = vsel %vm1273_vm3, %v3178_v4, %v2482_v21  ;;  %v2484_v4 = vld [vmem:[%s3724_s14] ss:$0 sm:$0xff] }
 0xf8a   :  { %v1294_v25 = vsel %vm1274_vm5, %v3184_v7, %v2483_v47 }
 0xf8b   :  { %1305 = vrot.lane.b32.xlu1 %v1295_v19, %s2931_s6  ;;  %v1355_v26 = vpack.c.bf16 %v1294_v25, %v1293_v48 }
 0xf8f   :  { %1366 = vrot.lane.b32.xlu1 %v1354_v22, %s2924_s8 }
 0xf93   :  { %1368 = vrot.lane.b32.xlu1 %v1355_v26, %s2924_s8 }
 0xffd   :  { %v1306_v5 = vpop.permute.xlu1 %1305 }
 0xffe   :  { %2650 = vmatmul.mubr.msk.bf16.vlgmr.msra.gmra.mrb[20].mxu0 %vm184_vm2, %v1306_v5  ;;  %vm3756_vm2 = vcmask 261120  }
 0xfff   :  { %2661 = vmatprep.mubr.msk.bf16.mxu0 %vm304_vm7, %v3128_v38 }
0x1001   :  { %v1367_v11 = vpop.permute.xlu1 %1366 }
0x1002   :  { %2655 = vmatprep.mubr.msk.bf16.mxu1 %vm243_vm4, %v1367_v11 }
0x1005   :  { %v1369_v27 = vpop.permute.xlu1 %1368 }
0x1006   :  { %2656 = vmatmul.mubr.msk.bf16.vlgmr.msra.gmra.mrb[20].mxu1 %vm243_vm4, %v1369_v27  ;;  %vm3757_vm4 = vmmov %vm3756_vm2 }
0x1007   :  { %2667 = vmatprep.mubr.msk.bf16.mxu1 %vm304_vm7, %v3108_v31 }
0x10d1   :  { %v1347_v7 = vpop.f32.mrb[20].mxu0 }
0x10d2   :  { %v2651_v10 = vpop.f32.mrb[21].mxu0  ;;  %v3439_v29 = vadd.f32 %v2484_v4, %v1347_v7 }
0x10d3   :  { %v1350_v28 = vpop.f32.mrb[22].mxu0 }
0x10d4   :  { %v3441_v13 = vadd.f32 %v2484_v4, %v1350_v28  ;;  %v2652_v30 = vpop.f32.mrb[23].mxu0 }
0x10d6   :  { %v1428_v32 = vpack.c.bf16 %v3441_v13, %v3439_v29 }
0x10d8   :  { %1479 = vrot.lane.b32.xlu1 %v1428_v32, %s2932_s10  ;;  %2659 = vmatprep.subr.bf16.mxu0 %v1428_v32 }
0x10d9   :  { %v2657_v31 = vpop.f32.mrb[20].mxu1  ;;  %2660 = vmatpush3.bf16.msra.mxu0 %v1428_v32 }
0x10da   :  { %v1413_v33 = vpop.f32.mrb[21].mxu1  ;;  %2671 = vmatprep.subr.bf16.mxu0 %v2921_v1  ;;  %v3458_v54 = vadd.f32 %v2657_v31, %v2486_v51 }
0x10db   :  { %v2658_v39 = vpop.f32.mrb[22].mxu1  ;;  %v3460_v43 = vadd.f32 %v2486_v51, %v1413_v33 }
0x10dc   :  { %v1416_v40 = vpop.f32.mrb[23].mxu1  ;;  %2662 = vmatmul.mubr.msk.bf16.vlgmr.msra.gmra.mrb[24].mxu0 %vm304_vm7, %v3158_v53  ;;  %v3464_v55 = vadd.f32 %v2658_v39, %v2486_v51  ;;  %vm2367_vm12 = vcmp.gt.f32.partialorder %v3458_v54, 0.0 }
0x10dd   :  { %2675 = vmatprep.mubr.msk.bf16.mxu0 %vm2922_vm1, %v2921_v1  ;;  %v3470_v57 = vadd.f32 %v2486_v51, %v1416_v40 }
0x10df   :  { %vm2366_vm0 = vcmp.gt.f32.partialorder %v3470_v57, 0.0 }
0x114a   :  { %v1480_v24 = vpop.permute.xlu1 %1479 }
0x114b   :  { %2665 = vmatprep.subr.bf16.mxu1 %v1480_v24 }
0x114c   :  { %2666 = vmatpush3.bf16.msra.mxu1 %v1480_v24 }
0x114f   :  { %2668 = vmatmul.mubr.msk.bf16.vlgmr.msra.gmra.mrb[24].mxu1 %vm304_vm7, %v3169_v61 }
0x1150   :  { %2681 = vmatprep.mubr.msk.bf16.mxu1 %vm304_vm7, %v3128_v38 }
0x11af   :  { %v2663_v42 = vpop.f32.mrb[24].mxu0 }
0x11b0   :  { %v1463_v46 = vpop.f32.mrb[25].mxu0 }
0x11b1   :  { %v2664_v49 = vpop.f32.mrb[26].mxu0 }
0x11b2   :  { %v1466_v50 = vpop.f32.mrb[27].mxu0 }
0x1222   :  { %v3462_v41 = vpop.f32.mrb[24].mxu1 }
0x1223   :  { %v1533_v61 = vadd.f32 %v3462_v41, %v3458_v54  ;;  %v3468_v38 = vpop.f32.mrb[25].mxu1 }
0x1224   :  { %v1531_v62 = vadd.f32 %v3468_v38, %v3460_v43  ;;  %v3474_v63 = vpop.f32.mrb[26].mxu1 }
0x1225   :  { %v1557_v52 = vmul.f32 %v2663_v42, %v1533_v61  ;;  %v1534_v0 = vadd.f32 %v3474_v63, %v3464_v55  ;;  %v3478_v60 = vpop.f32.mrb[27].mxu1 }
0x1226   :  { %v1555_v9 = vmul.f32 %v1531_v62, %v1463_v46  ;;  %v1532_v12 = vadd.f32 %v3478_v60, %v3470_v57 }
0x1227   :  { %v1558_v56 = vmul.f32 %v2664_v49, %v1534_v0  ;;  %v1561_v58 = vmul.f32 0.25, %v1557_v52 }
0x1228   :  { %v1556_v14 = vmul.f32 %v1532_v12, %v1466_v50  ;;  %v1559_v15 = vmul.f32 0.25, %v1555_v9 }
0x1229   :  { %1583 = vrot.lane.b32.xlu1 %v1561_v58, %s2924_s8  ;;  %v1562_v19 = vmul.f32 0.25, %v1558_v56  ;;  %v1569_v47 = vsel %vm304_vm7, %v1561_v58, 0.0 }
0x122a   :  { %1579 = vrot.lane.b32.xlu0 %v1559_v15, %s2924_s8  ;;  %v1560_v17 = vmul.f32 0.25, %v1556_v14  ;;  %v1563_v21 = vsel %vm304_vm7, %v1559_v15, 0.0 }
0x122b   :  { %v1572_v20 = vsel %vm304_vm7, %v1562_v19, 0.0 }
0x122c   :  { %v1566_v2 = vsel %vm304_vm7, %v1560_v17, 0.0 }
0x122d   :  { %1581 = vrot.lane.b32.xlu1 %v1560_v17, %s2924_s8 }
0x1231   :  { %1585 = vrot.lane.b32.xlu1 %v1562_v19, %s2924_s8 }
0x1249   :  { %1573 = vadd.xlane.f32.xlu0 %v1572_v20 }
0x124d   :  { %1567 = vadd.xlane.f32.xlu0 %v1566_v2 }
0x1255   :  { %1564 = vadd.xlane.f32.xlu1 %v1563_v21 }
0x1259   :  { %1570 = vadd.xlane.f32.xlu1 %v1569_v47 }
0x129b   :  { %v1584_v22 = vpop.permute.xlu1 %1583 }
0x129c   :  { %v1580_v48 = vpop.permute.xlu0 %1579  ;;  %v1597_v11 = vsel %vm304_vm7, %v1584_v22, 0.0 }
0x129d   :  { %v1591_v25 = vsel %vm304_vm7, %v1580_v48, 0.0 }
0x129e   :  { %1592 = vadd.xlane.f32.xlu1 %v1591_v25 }
0x129f   :  { %v1582_v26 = vpop.permute.xlu1 %1581 }
0x12a0   :  { %v1594_v5 = vsel %vm304_vm7, %v1582_v26, 0.0 }
0x12a1   :  { %1595 = vadd.xlane.f32.xlu0 %v1594_v5 }
0x12a2   :  { %1598 = vadd.xlane.f32.xlu1 %v1597_v11 }
0x12a3   :  { %v1586_v27 = vpop.permute.xlu1 %1585 }
0x12a4   :  { %v1600_v4 = vsel %vm304_vm7, %v1586_v27, 0.0 }
0x12a5   :  { %1601 = vadd.xlane.f32.xlu0 %v1600_v4 }
0x12d6   :  { %v1574_v10 = vpop.xlane.xlu0 %1573 }
0x12da   :  { %v1568_v30 = vpop.xlane.xlu0 %1567 }
0x12e2   :  { %v1565_v7 = vpop.xlane.xlu1 %1564 }
0x12e6   :  { %v1571_v28 = vpop.xlane.xlu1 %1570 }
0x132b   :  { %v1593_v32 = vpop.xlane.xlu1 %1592 }
0x132c   :  { %v3495_v31 = vsel %vm491_vm14, %v1565_v7, %v1593_v32 }
0x132d   :  { %1661 = vperm.xlu0 %2789, %v3495_v31  }
0x132e   :  { %v1596_v33 = vpop.xlane.xlu0 %1595 }
0x132f   :  { %v1599_v39 = vpop.xlane.xlu1 %1598  ;;  %v3504_v24 = vsel %vm491_vm14, %v1568_v30, %v1596_v33 }
0x1330   :  { %v3499_v40 = vsel %vm491_vm14, %v1571_v28, %v1599_v39 }
0x1331   :  { %1619 = vperm.xlu1 %2783, %v3499_v40   ;;  %2790 = vset.pattern.permute.xlu0 %v2923_v8 }
0x1332   :  { %1614 = vperm.xlu0 %2790, %v3504_v24   ;;  %v1602_v42 = vpop.xlane.xlu0 %1601 }
0x1333   :  { %v3510_v46 = vsel %vm491_vm14, %v1574_v10, %v1602_v42 }
0x1335   :  { %1609 = vperm.xlu1 %2783, %v3495_v31  }
0x1336   :  { %2792 = vset.pattern.permute.xlu0 %v2926_v59 }
0x1337   :  { %1673 = vperm.xlu0 %2792, %v3510_v46  }
0x1339   :  { %1624 = vperm.xlu1 %2783, %v3510_v46  }
0x133b   :  { %2793 = vset.pattern.permute.xlu0 %v2923_v8 }
0x133d   :  { %2791 = vset.pattern.permute.xlu1 %v2926_v59 }
0x133e   :  { %1665 = vperm.xlu1 %2791, %v3504_v24  }
0x1342   :  { %1669 = vperm.xlu1 %2791, %v3499_v40  }
0x1346   :  { %2794 = vset.pattern.permute.xlu1 %v2923_v8 }
0x13ac   :  { %v1662_v49 = vpop.permute.xlu0 %1661 }
0x13ad   :  { %v1676_v48 = vsel %vm3116_vm9, %v1662_v49, -inf }
0x13ae   :  { %v1680_v4 = vsel %vm304_vm7, %v1676_v48, -inf }
0x13b0   :  { %v1620_v50 = vpop.permute.xlu1 %1619 }
0x13b1   :  { %v1615_v51 = vpop.permute.xlu0 %1614  ;;  %v1629_v52 = vsel %vm3141_vm11, %v1620_v50, -inf }
0x13b2   :  { %v1628_v0 = vsel %vm3111_vm8, %v1615_v51, -inf  ;;  %v1633_v58 = vsel %vm304_vm7, %v1629_v52, -inf }
0x13b3   :  { %v1632_v14 = vsel %vm304_vm7, %v1628_v0, -inf }
0x13b4   :  { %v1610_v61 = vpop.permute.xlu1 %1609 }
0x13b5   :  { %v1627_v62 = vsel %vm3116_vm9, %v1610_v61, -inf }
0x13b6   :  { %v1631_v9 = vsel %vm304_vm7, %v1627_v62, -inf  ;;  %v1674_v20 = vpop.permute.xlu0 %1673 }
0x13b7   :  { %v1635_v17 = vmax.f32 %v1631_v9, %v1632_v14  ;;  %v1679_v25 = vsel %vm3136_vm10, %v1674_v20, -inf }
0x13b8   :  { %v1625_v12 = vpop.permute.xlu1 %1624  ;;  %v1683_v7 = vsel %vm304_vm7, %v1679_v25, -inf }
0x13b9   :  { %v1630_v56 = vsel %vm3136_vm10, %v1625_v12, -inf }
0x13ba   :  { %v1634_v15 = vsel %vm304_vm7, %v1630_v56, -inf }
0x13bb   :  { %v1636_v19 = vmax.f32 %v1633_v58, %v1634_v15 }
0x13bd   :  { %v1637_v2 = vmax.f32 %v1635_v17, %v1636_v19  ;;  %v1666_v21 = vpop.permute.xlu1 %1665 }
0x13be   :  { %v1677_v47 = vsel %vm3111_vm8, %v1666_v21, -inf }
0x13bf   :  { %v1638_v22 = vrot.slane %v1637_v2, 4  ;;  %v1681_v5 = vsel %vm304_vm7, %v1677_v47, -inf }
0x13c0   :  { %v1684_v30 = vmax.f32 %v1680_v4, %v1681_v5 }
0x13c1   :  { %v1639_v26 = vmax.f32 %v1637_v2, %v1638_v22  ;;  %v1670_v11 = vpop.permute.xlu1 %1669 }
0x13c2   :  { %v1678_v27 = vsel %vm3141_vm11, %v1670_v11, -inf }
0x13c3   :  { %v1640_v10 = vrot.slane %v1639_v26, 2  ;;  %v1682_v28 = vsel %vm304_vm7, %v1678_v27, -inf }
0x13c4   :  { %v1685_v32 = vmax.f32 %v1682_v28, %v1683_v7 }
0x13c5   :  { %v1641_v33 = vmax.f32 %v1639_v26, %v1640_v10 }
0x13c6   :  { %v1686_v39 = vmax.f32 %v1684_v30, %v1685_v32 }
0x13c7   :  { %v1642_v42 = vrot.slane %v1641_v33, 1 }
0x13c8   :  { %v1687_v49 = vrot.slane %v1686_v39, 4 }
0x13c9   :  { %v1643_v50 = vmax.f32 %v1641_v33, %v1642_v42 }
0x13ca   :  { %v1688_v51 = vmax.f32 %v1686_v39, %v1687_v49 }
0x13cb   :  { %v1645_v61 = vsel %vm3111_vm8, %v1643_v50, 0.0  ;;  %v1644_v62 = vsel %vm3116_vm9, %v1643_v50, 0.0  ;;  %v1647_v20 = vsel %vm3136_vm10, %v1643_v50, 0.0  ;;  %v1646_v2 = vsel %vm3141_vm11, %v1643_v50, 0.0 }
0x13cc   :  { %v1689_v52 = vrot.slane %v1688_v51, 2  ;;  %v1651_v0 = vsel %vm304_vm7, %v1645_v61, 0.0  ;;  %v1648_v9 = vsel %vm304_vm7, %v1644_v62, 0.0  ;;  %v1657_v21 = vsel %vm304_vm7, %v1647_v20, 0.0 }
0x13cd   :  { %1652 = vadd.xlane.f32.xlu0 %v1651_v0  ;;  %1649 = vadd.xlane.f32.xlu1 %v1648_v9  ;;  %v1654_v34 = vsel %vm304_vm7, %v1646_v2, 0.0 }
0x13ce   :  { %v1690_v12 = vmax.f32 %v1688_v51, %v1689_v52 }
0x13d0   :  { %v1691_v56 = vrot.slane %v1690_v12, 1 }
0x13d2   :  { %v1692_v58 = vmax.f32 %v1690_v12, %v1691_v56 }
0x13d4   :  { %v1694_v14 = vsel %vm3111_vm8, %v1692_v58, 0.0  ;;  %v1693_v15 = vsel %vm3116_vm9, %v1692_v58, 0.0  ;;  %v1696_v35 = vsel %vm3136_vm10, %v1692_v58, 0.0  ;;  %v1695_v47 = vsel %vm3141_vm11, %v1692_v58, 0.0 }
0x13d5   :  { %v1700_v17 = vsel %vm304_vm7, %v1694_v14, 0.0  ;;  %v1697_v19 = vsel %vm304_vm7, %v1693_v15, 0.0  ;;  %v1706_v22 = vsel %vm304_vm7, %v1696_v35, 0.0  ;;  %v1703_v48 = vsel %vm304_vm7, %v1695_v47, 0.0 }
0x13d6   :  { %1701 = vadd.xlane.f32.xlu1 %v1700_v17  ;;  %1698 = vadd.xlane.f32.xlu0 %v1697_v19  ;;  %vm3759_vm8 = vcmask 1041408  }
0x13d7   :  { %vm3760_vm9 = vmmov %vm3759_vm8 }
0x13d8   :  { %vm3762_vm5 = vmmov %vm3759_vm8 }
0x13d9   :  { %vm3763_vm15 = vmmov %vm3762_vm5 }
0x13da   :  { %1658 = vadd.xlane.f32.xlu1 %v1657_v21  ;;  %1655 = vadd.xlane.f32.xlu0 %v1654_v34 }
0x13de   :  { %1707 = vadd.xlane.f32.xlu1 %v1706_v22  ;;  %1704 = vadd.xlane.f32.xlu0 %v1703_v48 }
0x145a   :  { %v1650_v25 = vpop.xlane.xlu1 %1649  ;;  %v1653_v26 = vpop.xlane.xlu0 %1652 }
0x1463   :  { %v1702_v5 = vpop.xlane.xlu1 %1701  ;;  %v1699_v11 = vpop.xlane.xlu0 %1698 }
0x1464   :  { %v1710_v27 = vsel %vm491_vm14, %v1653_v26, %v1702_v5  ;;  %v1709_v4 = vsel %vm491_vm14, %v1650_v25, %v1699_v11 }
0x1465   :  { %v1714_v44 = vsub.f32 %v3504_v24, %v1710_v27  ;;  %v1713_v7 = vsub.f32 %v3495_v31, %v1709_v4 }
0x1467   :  { %v1719_v45 = vmul.f32 1.442695, %v1714_v44  ;;  %v1717_v10 = vmul.f32 1.442695, %v1713_v7  ;;  %v1659_v28 = vpop.xlane.xlu1 %1658  ;;  %v1656_v30 = vpop.xlane.xlu0 %1655 }
0x1469   :  { %2863 = vpow2.f32 %v1719_v45 }
0x146a   :  { %2865 = vpow2.f32 %v1717_v10 }
0x146b   :  { %v1708_v32 = vpop.xlane.xlu1 %1707  ;;  %v1705_v33 = vpop.xlane.xlu0 %1704 }
0x146c   :  { %v1712_v39 = vsel %vm491_vm14, %v1659_v28, %v1708_v32  ;;  %v1711_v42 = vsel %vm491_vm14, %v1656_v30, %v1705_v33 }
0x146d   :  { %v1716_v49 = vsub.f32 %v3510_v46, %v1712_v39  ;;  %v1715_v50 = vsub.f32 %v3499_v40, %v1711_v42 }
0x146f   :  { %v1723_v51 = vmul.f32 1.442695, %v1716_v49  ;;  %v1721_v24 = vmul.f32 1.442695, %v1715_v50 }
0x1471   :  { %2867 = vpow2.f32 %v1723_v51 }
0x1472   :  { %2869 = vpow2.f32 %v1721_v24 }
0x1473   :  { %v2864_v31 = vpop.eup %2863 }
0x1474   :  { %v2866_v61 = vpop.eup %2865 }
0x1475   :  { %v1725_v62 = vpack.c.bf16 %v2864_v31, %v2866_v61 }
0x1477   :  { %2672 = vmatpush3.bf16.msra.mxu0 %v1725_v62 }
0x1478   :  { %2673 = vmatprep.subr.bf16.mxu0 %v2921_v1 }
0x147b   :  { %v2868_v52 = vpop.eup %2867 }
0x147c   :  { %v2870_v0 = vpop.eup %2869 }
0x147d   :  { %v1726_v9 = vpack.c.bf16 %v2868_v52, %v2870_v0 }
0x147f   :  { %2674 = vmatpush3.bf16.msra.mxu0 %v1726_v9 }
0x1480   :  { %2685 = vmatprep.subr.bf16.mxu0 %v2921_v1 }
0x1482   :  { %2676 = vmatmul.mubr.msk.bf16.vlgmr.msra.gmra.mrb[28].mxu0 %vm3756_vm2, %v3303_v18 }
0x1483   :  { %2689 = vmatprep.mubr.msk.bf16.mxu0 %vm2922_vm1, %v2921_v1 }
0x1555   :  { %v1761_v40 = vpop.f32.mrb[28].mxu0 }
0x1556   :  { %v2677_v46 = vpop.f32.mrb[29].mxu0 }
0x1557   :  { %v1764_v12 = vpop.f32.mrb[30].mxu0 }
0x1558   :  { %v1768_v56 = vpack.c.bf16 %v1764_v12, %v1761_v40  ;;  %v2678_v58 = vpop.f32.mrb[31].mxu0 }
0x155a   :  { %2679 = vmatprep.subr.bf16.mxu1 %v1768_v56 }
0x155b   :  { %2680 = vmatpush3.bf16.msra.mxu1 %v1768_v56 }
0x155c   :  { %2723 = vmatprep.subr.bf16.mxu1 %v2930_v3 }
0x155e   :  { %2682 = vmatmul.mubr.msk.bf16.vlgmr.msra.gmra.mrb[28].mxu1 %vm304_vm7, %v3158_v53 }
0x155f   :  { %2697 = vmatprep.mubr.msk.f32.mxu1 %vm2922_vm1, %v2921_v1 }
0x1631   :  { %v2683_v14 = vpop.f32.mrb[28].mxu1 }
0x1632   :  { %v1820_v15 = vmax.f32 %v2683_v14, 1e-30  ;;  %v1803_v17 = vpop.f32.mrb[29].mxu1 }
0x1633   :  { %v1818_v19 = vmax.f32 %v1803_v17, 1e-30  ;;  %v2684_v20 = vpop.f32.mrb[30].mxu1 }
0x1634   :  { %2871 = vrcp.f32 %v1820_v15  ;;  %v1806_v2 = vpop.f32.mrb[31].mxu1  ;;  %v1821_v21 = vmax.f32 %v2684_v20, 1e-30 }
0x1635   :  { %2873 = vrcp.f32 %v1818_v19  ;;  %v1819_v22 = vmax.f32 %v1806_v2, 1e-30 }
0x1636   :  { %2875 = vrcp.f32 %v1821_v21 }
0x1637   :  { %2877 = vrcp.f32 %v1819_v22 }
0x163e   :  { %v2872_v34 = vpop.eup %2871 }
0x163f   :  { %v2874_v35 = vpop.eup %2873  ;;  %v1828_v47 = vmul.f32 %v2872_v34, %v2870_v0 }
0x1640   :  { %v1826_v48 = vmul.f32 %v2874_v35, %v2866_v61  ;;  %v2876_v53 = vpop.eup %2875 }
0x1641   :  { %1842 = vperm.xlu1 %2794, %v1828_v47   ;;  %v1829_v25 = vmul.f32 %v2876_v53, %v2868_v52  ;;  %v2878_v26 = vpop.eup %2877 }
0x1642   :  { %1832 = vperm.xlu0 %2793, %v1826_v48   ;;  %v1827_v5 = vmul.f32 %v2878_v26, %v2864_v31 }
0x1645   :  { %2795 = vset.pattern.permute.xlu1 %v2926_v59 }
0x1646   :  { %1863 = vperm.xlu1 %2795, %v1828_v47   ;;  %1541 = vrot.lane.b32.xlu0 %v3470_v57, %s2933_s16 }
0x164a   :  { %1855 = vperm.xlu1 %2795, %v1826_v48   ;;  %1545 = vrot.lane.b32.xlu0 %v3464_v55, %s2933_s16 }
0x164e   :  { %2796 = vset.pattern.permute.xlu1 %v2923_v8 }
0x164f   :  { %1847 = vperm.xlu1 %2796, %v1829_v25  }
0x1653   :  { %1837 = vperm.xlu1 %2796, %v1827_v5  }
0x1657   :  { %2797 = vset.pattern.permute.xlu1 %v2926_v59 }
0x1658   :  { %1859 = vperm.xlu1 %2797, %v1827_v5  }
0x165c   :  { %1867 = vperm.xlu1 %2797, %v1829_v25  }
0x1660   :  { %1539 = vrot.lane.b32.xlu1 %v3460_v43, %s2933_s16 }
0x1661   :  { %2823 = vset.pattern.permute.xlu1 %v2923_v8 }
0x1664   :  { %1543 = vrot.lane.b32.xlu1 %v3458_v54, %s2933_s16 }
0x16c0   :  { %v1843_v11 = vpop.permute.xlu1 %1842 }
0x16c1   :  { %v1833_v45 = vpop.permute.xlu0 %1832 }
0x16c5   :  { %v1864_v27 = vpop.permute.xlu1 %1863  ;;  %v1542_v28 = vpop.permute.xlu0 %1541 }
0x16c6   :  { %v1552_v32 = vadd.f32 %v1542_v28, %v3478_v60 }
0x16c9   :  { %v1856_v4 = vpop.permute.xlu1 %1855  ;;  %v1546_v33 = vpop.permute.xlu0 %1545 }
0x16ca   :  { %v1554_v51 = vadd.f32 %v3474_v63, %v1546_v33 }
0x16ce   :  { %v1848_v44 = vpop.permute.xlu1 %1847 }
0x16cf   :  { %v1853_v52 = vmul.f32 %v1848_v44, %v1554_v51 }
0x16d2   :  { %v1838_v7 = vpop.permute.xlu1 %1837 }
0x16d3   :  { %v1851_v42 = vmul.f32 %v1838_v7, %v1552_v32 }
0x16d7   :  { %v1860_v10 = vpop.permute.xlu1 %1859 }
0x16d8   :  { %v1871_v8 = vmul.f32 %v1860_v10, %v1552_v32 }
0x16db   :  { %v1868_v30 = vpop.permute.xlu1 %1867 }
0x16dc   :  { %v1873_v0 = vmul.f32 %v1868_v30, %v1554_v51 }
0x16df   :  { %v1540_v59 = vpop.permute.xlu1 %1539 }
0x16e0   :  { %v1551_v39 = vadd.f32 %v1540_v59, %v3468_v38 }
0x16e2   :  { %v1850_v49 = vmul.f32 %v1833_v45, %v1551_v39  ;;  %v1870_v50 = vmul.f32 %v1856_v4, %v1551_v39 }
0x16e3   :  { %v1544_v24 = vpop.permute.xlu1 %1543 }
0x16e4   :  { %v2798_v31 = vpack.i.bf16 %v1851_v42, %v1850_v49  ;;  %v1553_v61 = vadd.f32 %v3462_v41, %v1544_v24  ;;  %v2808_v62 = vpack.i.bf16 %v1871_v8, %v1870_v50  ;;  %v1973_v42 = vmul.f32 16.0, %v866_v6 }
0x16e6   :  { %v1852_v9 = vmul.f32 %v1843_v11, %v1553_v61  ;;  %v1872_v40 = vmul.f32 %v1864_v27, %v1553_v61  ;;  %2809 = vrot.lane.b32.xlu0 %v2808_v62, %s2932_s10  ;;  %2799 = vrot.lane.b32.xlu1 %v2798_v31, %s2932_s10  ;;  %2879 = vrcp.f32 %v1973_v42  ;;  %v2372_v42 = vmin.f32 %v3464_v55, 0.0 }
0x16e8   :  { %v2803_v38 = vpack.i.bf16 %v1853_v52, %v1852_v9  ;;  %v2813_v60 = vpack.i.bf16 %v1873_v0, %v1872_v40 }
0x16ea   :  { %2814 = vrot.lane.b32.xlu0 %v2813_v60, %s2932_s10  ;;  %2804 = vrot.lane.b32.xlu1 %v2803_v38, %s2932_s10 }
0x16f0   :  { %v2880_v8 = vpop.eup %2879 }
0x1758   :  { %v2810_v63 = vpop.permute.xlu0 %2809  ;;  %v2800_v46 = vpop.permute.xlu1 %2799 }
0x1759   :  { %v2812_v12 = vunpack.i.h.bf16 %v2810_v63  ;;  %v2811_v56 = vunpack.i.l.bf16 %v2810_v63  ;;  %v2802_v41 = vunpack.i.h.bf16 %v2800_v46  ;;  %v2801_v58 = vunpack.i.l.bf16 %v2800_v46 }
0x175b   :  { %v1907_v14 = vsel %vm304_vm7, %v2802_v41, %v2812_v12  ;;  %v1906_v15 = vsel %vm304_vm7, %v2801_v58, %v2811_v56 }
0x175c   :  { %v1910_v17 = vpack.c.bf16 %v1907_v14, %v1906_v15  ;;  %v2815_v19 = vpop.permute.xlu0 %2814  ;;  %v2805_v20 = vpop.permute.xlu1 %2804 }
0x175d   :  { %v2817_v2 = vunpack.i.h.bf16 %v2815_v19  ;;  %v2816_v21 = vunpack.i.l.bf16 %v2815_v19  ;;  %v2807_v34 = vunpack.i.h.bf16 %v2805_v20  ;;  %v2806_v35 = vunpack.i.l.bf16 %v2805_v20 }
0x175e   :  { %2686 = vmatpush3.bf16.msra.mxu0 %v1910_v17 }
0x175f   :  { %v1909_v47 = vsel %vm304_vm7, %v2807_v34, %v2817_v2  ;;  %v1908_v22 = vsel %vm304_vm7, %v2806_v35, %v2816_v21  ;;  %2687 = vmatprep.subr.bf16.mxu0 %v2921_v1  ;;  %v2371_v21 = vmin.f32 %v3458_v54, 0.0  ;;  %v2370_v35 = vmin.f32 %v3470_v57, 0.0 }
0x1760   :  { %v1911_v48 = vpack.c.bf16 %v1909_v47, %v1908_v22 }
0x1761   :  { %v2377_v34 = vmul.f32 1.442695, %v2371_v21  ;;  %v2375_v47 = vmul.f32 1.442695, %v2370_v35 }
0x1762   :  { %2688 = vmatpush3.bf16.msra.mxu0 %v1911_v48 }
0x1763   :  { %2726 = vmatprep.subr.bf16.mxu0 %v2930_v3 }
0x1765   :  { %2690 = vmatmul.mubr.msk.bf16.vlgmr.msra.gmra.mrb[32].mxu0 %vm3757_vm4, %v3303_v18  ;;  %vm2368_vm4 = vcmp.gt.f32.partialorder %v3464_v55, 0.0 }
0x1766   :  { %2709 = vmatprep.mubr.msk.f32.mxu0 %vm2922_vm1, %v2921_v1  ;;  %vm3758_vm1 = vcmask 123904  }
0x1767   :  { %vm3761_vm10 = vmmov %vm3758_vm1 }
0x1838   :  { %v1946_v53 = vpop.f32.mrb[32].mxu0 }
0x1839   :  { %v1953_v25 = vmul.f32 0.5, %v1946_v53  ;;  %v2691_v26 = vpop.f32.mrb[33].mxu0 }
0x183a   :  { %v1949_v5 = vpop.f32.mrb[34].mxu0 }
0x183b   :  { %v1954_v11 = vmul.f32 0.5, %v1949_v5  ;;  %1957 = vrot.lane.b32.xlu1 %v1953_v25, %s2932_s10  ;;  %v2692_v27 = vpop.f32.mrb[35].mxu0 }
0x183d   :  { %1959 = vrot.lane.b32.xlu0 %v1954_v11, %s2932_s10 }
0x183f   :  { %1965 = vrot.lane.b32.xlu1 %v1953_v25, %s2931_s6 }
0x1841   :  { %1967 = vrot.lane.b32.xlu0 %v1954_v11, %s2931_s6  ;;  %s2934_s6 = smov [#allocation2]  }
0x1842   :  { %s2425_s21 = sshll.u32 %s2934_s6, 4  ;;  %s2426_s21 = int_to_ptr.vmem [resolvable:$true] %s2425_s21 }
0x1843   :  { %s2897_s1 = scalar_lea.vmem %s2426_s21, 256  ;;  %p2902_p1 = scmp.lt.s32.totalorder %s2426_s21, %s2426_s21 }
0x1844   :  { %p2898_p0 = scmp.ne.s32.totalorder %s2426_s21, %s2897_s1  ;;  %p2903_p2 = scmp.lt.s32.totalorder %s2897_s1, %s2897_s1 }
0x1846   :  { %p2904_p3 = por %p2903_p2, %p2902_p1 }
0x1848   :  { %p2905_p4 = pnand %p2904_p3, %p2898_p0 }
0x18ad   :  { %v1958_v3 = vpop.permute.xlu1 %1957 }
0x18ae   :  { %v1963_v44 = vadd.f32 %v1958_v3, %v3439_v29  ;;  %v2506_v3 = vld [vmem:[%s3728_s18] ss:$0 sm:$0xff] }
0x18af   :  { %v1960_v4 = vpop.permute.xlu0 %1959 }
0x18b0   :  { %v1964_v1 = vadd.f32 %v1960_v4, %v3441_v13 }
0x18b1   :  { %v1966_v18 = vpop.permute.xlu1 %1965 }
0x18b2   :  { %v1971_v45 = vadd.f32 %v1966_v18, %v1963_v44 }
0x18b3   :  { %v1968_v7 = vpop.permute.xlu0 %1967 }
0x18b4   :  { %v1972_v10 = vadd.f32 %v1968_v7, %v1964_v1 }
0x18b6   :  { %v2818_v28 = vpack.i.bf16 %v1972_v10, %v1971_v45 }
0x18b8   :  { %2819 = vrot.lane.b32.xlu1 %v2818_v28, %s2933_s16 }
0x192a   :  { %v2820_v30 = vpop.permute.xlu1 %2819 }
0x192b   :  { %v2822_v59 = vunpack.i.h.bf16 %v2820_v30  ;;  %v2821_v32 = vunpack.i.l.bf16 %v2820_v30 }
0x192d   :  { %v2724_v33 = vpack.c.bf16 %v2822_v59, %v2821_v32 }
0x192f   :  { %2725 = vmatpush3.bf16.msra.mxu1 %v2724_v33 }
0x1932   :  { %2698 = vmatmul.mubr.msk.f32.vlgmr.msra.gmra.mrb[18].mxu1 %vm304_vm7, %v3350_v23 }
0x1933   :  { %2702 = vmatprep.mubr.msk.f32.mxu1 %vm955_vm13, %v3377_v37 }
0x1a05   :  { %v2048_v29 = vpop.f32.mrb[18].mxu1 }
0x1a06   :  { %v2052_v13 = vsel %vm3758_vm1, %v2048_v29, 0.0  ;;  %v2699_v39 = vpop.f32.mrb[19].mxu1 }
0x1a07   :  { %2053 = vadd.xlane.f32.xlu0 %v2052_v13 }
0x1a94   :  { %v2054_v49 = vpop.xlane.xlu0 %2053 }
0x1a95   :  { %v2056_v50 = vmul.f32 %v2880_v8, %v2054_v49 }
0x1a97   :  { %2700 = vmatprep.subr.msk.mxu1 %vm3759_vm8, %v2056_v50 }
0x1a98   :  { %2701 = vmatpush3.msk.msra.mxu1 %vm3760_vm9, %v2056_v50  ;;  %v2379_v50 = vmul.f32 1.442695, %v2372_v42 }
0x1a99   :  { %2703 = vmatmul.mubr.msk.f32.vlgmr.msra.gmra.mrb[32].mxu1 %vm955_vm13, %v3374_v36 }
0x1a9a   :  { %2714 = vmatprep.mubr.msk.f32.mxu1 %vm955_vm13, %v3377_v37 }
0x1b6c   :  { %v2704_v51 = vpop.f32.mrb[32].mxu1 }
0x1b6d   :  { %v2126_v24 = vpop.f32.mrb[33].mxu1 }
0x1b6e   :  { %2137 = vperm.xlu1 %2823, %v2126_v24  }
0x1b72   :  { %2142 = vperm.xlu1 %2823, %v2704_v51  }
0x1bed   :  { %v2138_v16 = vpop.permute.xlu1 %2137 }
0x1bee   :  { %v3636_v6 = vsub.f32 %v1971_v45, %v2138_v16 }
0x1bf0   :  { %v2147_v62 = vmul.f32 %v3636_v6, %v3636_v6 }
0x1bf1   :  { %v2143_v31 = vpop.permute.xlu1 %2142 }
0x1bf2   :  { %v3638_v61 = vsub.f32 %v1972_v10, %v2143_v31 }
0x1bf4   :  { %v2148_v52 = vmul.f32 %v3638_v61, %v3638_v61 }
0x1bf6   :  { %v2824_v0 = vpack.i.bf16 %v2148_v52, %v2147_v62 }
0x1bf8   :  { %2825 = vrot.lane.b32.xlu1 %v2824_v0, %s2933_s16 }
0x1c6a   :  { %v2826_v37 = vpop.permute.xlu1 %2825 }
0x1c6b   :  { %v2828_v9 = vunpack.i.h.bf16 %v2826_v37  ;;  %v2827_v40 = vunpack.i.l.bf16 %v2826_v37 }
0x1c6d   :  { %v2727_v38 = vpack.c.bf16 %v2828_v9, %v2827_v40 }
0x1c6f   :  { %2728 = vmatpush3.bf16.msra.mxu0 %v2727_v38 }
0x1c72   :  { %2710 = vmatmul.mubr.msk.f32.vlgmr.msra.gmra.mrb[18].mxu0 %vm304_vm7, %v3350_v23  ;;  %v2369_v23 = vmin.f32 %v3460_v43, 0.0 }
0x1c74   :  { %v2373_v2 = vmul.f32 1.442695, %v2369_v23 }
0x1d45   :  { %v2223_v60 = vpop.f32.mrb[18].mxu0 }
0x1d46   :  { %v2227_v63 = vsel %vm3761_vm10, %v2223_v60, 0.0  ;;  %v2711_v46 = vpop.f32.mrb[19].mxu0 }
0x1d47   :  { %2228 = vadd.xlane.f32.xlu1 %v2227_v63 }
0x1dd4   :  { %v2229_v12 = vpop.xlane.xlu1 %2228 }
0x1dd5   :  { %v2230_v56 = vmul.f32 %v2880_v8, %v2229_v12 }
0x1dd7   :  { %v2231_v41 = vadd.f32 1e-05, %v2230_v56 }
0x1dd9   :  { %2881 = vrsqrt.f32 %v2231_v41  ;;  %vm2234_vm11 = vcmp.eq.f32.partialorder %v2231_v41, inf  ;;  %v2237_v15 = vand.u32 2147483648, %v2231_v41  ;;  %vm2236_vm14 = vcmp.eq.f32.partialorder %v2231_v41, 0.0 }
0x1de3   :  { %v2882_v58 = vpop.eup %2881 }
0x1de4   :  { %v2233_v14 = vmul.f32 %v2882_v58, %v2231_v41 }
0x1de6   :  { %v2235_v17 = vsel %vm2234_vm11, %v2231_v41, %v2233_v14 }
0x1de7   :  { %v2238_v19 = vsel %vm2236_vm14, %v2237_v15, %v2235_v17 }
0x1de8   :  { %2883 = vrcp.f32 %v2238_v19 }
0x1de9   :  { %2885 = vpow2.f32 %v2373_v2 }
0x1dea   :  { %2887 = vpow2.f32 %v2377_v34 }
0x1deb   :  { %2889 = vpow2.f32 %v2375_v47 }
0x1df2   :  { %v2884_v20 = vpop.eup %2883 }
0x1df3   :  { %2712 = vmatprep.subr.msk.mxu1 %vm3762_vm5, %v2884_v20  ;;  %v2886_v22 = vpop.eup %2885 }
0x1df4   :  { %2713 = vmatpush3.msk.msra.mxu1 %vm3763_vm15, %v2884_v20  ;;  %v2509_v53 = vadd.f32 -1.0, %v2886_v22  ;;  %v2888_v25 = vpop.eup %2887 }
0x1df5   :  { %2715 = vmatmul.mubr.msk.f32.vlgmr.msra.gmra.mrb[34].mxu1 %vm955_vm13, %v3374_v36  ;;  %vm2365_vm13 = vcmp.gt.f32.partialorder %v3460_v43, 0.0  ;;  %v2505_v36 = vld [vmem:[%s3727_s17] ss:$0 sm:$0xff]  ;;  %v2511_v11 = vadd.f32 -1.0, %v2888_v25  ;;  %v2890_v27 = vpop.eup %2889 }
0x1df6   :  { %v2385_v5 = vsel %vm2365_vm13, %v3460_v43, %v2509_v53  ;;  %v2510_v18 = vadd.f32 -1.0, %v2890_v27 }
0x1df7   :  { %v2387_v4 = vsel %vm2367_vm12, %v3458_v54, %v2511_v11 }
0x1df8   :  { %v2386_v43 = vsel %vm2366_vm0, %v3470_v57, %v2510_v18 }
0x1ec8   :  { %v2716_v48 = vpop.f32.mrb[34].mxu1 }
0x1ec9   :  { %2326 = vperm.xlu1 %2823, %v2716_v48   ;;  %v2310_v26 = vpop.f32.mrb[35].mxu1 }
0x1eca   :  { %2321 = vperm.xlu0 %2793, %v2310_v26  }
0x1ecd   :  { %2403 = vrot.lane.b32.xlu1 %v2385_v5, %s2932_s10 }
0x1ece   :  { %2337 = vrot.lane.b32.xlu0 %v2505_v36, %s2932_s10 }
0x1ed1   :  { %2407 = vrot.lane.b32.xlu1 %v2387_v4, %s2932_s10 }
0x1ed2   :  { %2348 = vrot.lane.b32.xlu0 %v2506_v3, %s2932_s10 }
0x1ed6   :  { %2405 = vrot.lane.b32.xlu0 %v2386_v43, %s2932_s10 }
0x1f48   :  { %v2327_v44 = vpop.permute.xlu1 %2326 }
0x1f49   :  { %v2322_v1 = vpop.permute.xlu0 %2321  ;;  %v2330_v45 = vmul.f32 %v2327_v44, %v3638_v61 }
0x1f4a   :  { %v2329_v10 = vmul.f32 %v2322_v1, %v3636_v6 }
0x1f4c   :  { %v2404_v7 = vpop.permute.xlu1 %2403 }
0x1f4d   :  { %2416 = vst.msk [vmem:[%s3730_s20] sm:$0xff] %vm2415_vm6, %v2404_v7  ;;  %v2338_v54 = vpop.permute.xlu0 %2337 }
0x1f4e   :  { %v2340_v28 = vmul.f32 %v2338_v54, %v2329_v10  ;;  %v2341_v30 = vmul.f32 %v2338_v54, %v2330_v45 }
0x1f50   :  { %v2408_v59 = vpop.permute.xlu1 %2407 }
0x1f51   :  { %2418 = vst.msk [vmem:[%s3730_s20 + $0x10] sm:$0xff] %vm2415_vm6, %v2408_v59  ;;  %v2349_v57 = vpop.permute.xlu0 %2348 }
0x1f52   :  { %v2351_v32 = vadd.f32 %v2349_v57, %v2340_v28  ;;  %v2352_v33 = vadd.f32 %v2349_v57, %v2341_v30 }
0x1f54   :  { %v2355_v29 = vmin.f32 %v2351_v32, 0.0  ;;  %v2356_v13 = vmin.f32 %v2352_v33, 0.0  ;;  %vm2354_vm3 = vcmp.gt.f32.partialorder %v2352_v33, 0.0  ;;  %vm2353_vm2 = vcmp.gt.f32.partialorder %v2351_v32, 0.0 }
0x1f55   :  { %v2406_v39 = vpop.permute.xlu0 %2405 }
0x1f56   :  { %v2357_v8 = vmul.f32 1.442695, %v2355_v29  ;;  %v2359_v49 = vmul.f32 1.442695, %v2356_v13  ;;  %2417 = vst.msk [vmem:[%s3730_s20 + $0x8] sm:$0xff] %vm2415_vm6, %v2406_v39 }
0x1f58   :  { %2891 = vpow2.f32 %v2357_v8 }
0x1f59   :  { %2893 = vpow2.f32 %v2359_v49 }
0x1f5a   :  { %2895 = vpow2.f32 %v2379_v50 }
0x1f62   :  { %v2892_v51 = vpop.eup %2891 }
0x1f63   :  { %v2894_v24 = vpop.eup %2893  ;;  %v2507_v31 = vadd.f32 -1.0, %v2892_v51 }
0x1f64   :  { %v2508_v16 = vadd.f32 -1.0, %v2894_v24  ;;  %v2896_v61 = vpop.eup %2895 }
0x1f65   :  { %v2363_v62 = vsel %vm2353_vm2, %v2351_v32, %v2507_v31  ;;  %v2512_v52 = vadd.f32 -1.0, %v2896_v61 }
0x1f66   :  { %v2364_v6 = vsel %vm2354_vm3, %v2352_v33, %v2508_v16 }
0x1f67   :  { %2393 = vrot.lane.b32.xlu0 %v2364_v6, %s2933_s16  ;;  %v2388_v0 = vsel %vm2368_vm4, %v3464_v55, %v2512_v52 }
0x1f6b   :  { %2391 = vrot.lane.b32.xlu0 %v2363_v62, %s2933_s16 }
0x1f6f   :  { %2409 = vrot.lane.b32.xlu0 %v2388_v0, %s2932_s10 }
0x1fd9   :  { %v2394_v37 = vpop.permute.xlu0 %2393 }
0x1fda   :  { %2398 = vst.msk [vmem:[#allocation2 + $0x8] sm:$0xff] %vm304_vm7, %v2394_v37 }
0x1fdd   :  { %v2392_v9 = vpop.permute.xlu0 %2391 }
0x1fde   :  { %2397 = vst.msk [vmem:[#allocation2] sm:$0xff] %vm304_vm7, %v2392_v9 }
0x1fdf   :  { %2908 = shalt.err (!%p2905_p4)
}
0x1fe0   :  { %s2909_s5 = scalar_lea.hbm %s3729_s19, 256 }
0x1fe1   :  { %p2910_p5 = scmp.ne.s32.totalorder %s3729_s19, %s2909_s5  ;;  %p2913_p6 = scmp.lt.u32.totalorder %s2909_s5, %s3729_s19 }
0x1fe3   :  { %p2915_p7 = pnand %p2913_p6, %p2910_p5 }
0x1fe5   :  { %2918 = shalt.err (!%p2915_p7)
}
0x1fe6   :  { %s2935_s25 = smov 128   ;;  %s2936_s11 = smov 8   ;;  %v2410_v55 = vpop.permute.xlu0 %2409 }
0x1fe7   :  { %2431 = dma.vmem_to_hbm [thread:$0]  %s2426_s21, 256, %s3729_s19, [#allocation3], %s2935_s25, %s2935_s25, %s2936_s11  }
0x1fe8   :  { %2419 = vst.msk [vmem:[%s3730_s20 + $0x18] sm:$0xff] %vm2415_vm6, %v2410_v55 }
0x1fe9   :  { %2919 = dma.done.wait [#allocation3], 256  }
0x1fea   :  { %2920 = vsyncadd [#allocation3], 4294967040 }
0x1feb   :  { %2439 = vsyncpa [#allocation3], 1 }

</bundles_post_ra>
